<compile_context>
chip_gen: v7x
topology: tpu7x:2x2x1
jax: 0.10.0
libtpu: 0.0.40
codegen_flags: <defaults>
</compile_context>

<pallas_src>
import jax
import jax.numpy as jnp
from jax.experimental import pallas as pl
from jax.experimental.pallas import tpu as pltpu


# --------------------------------------------------------------------------- #
# Kernels
# --------------------------------------------------------------------------- #
def ffn_kernel_resident(x_ref, w1_ref, b1_ref, w2_ref, b2_ref, o_ref):
    """Weight-resident path: full W1/W2 in VMEM, single shot per token tile."""
    x = x_ref[...]
    h = jnp.dot(x.astype(w1_ref.dtype), w1_ref[...],
                preferred_element_type=jnp.float32)
    h = jnp.tanh(h + b1_ref[...].astype(jnp.float32))
    y = jnp.dot(h.astype(w2_ref.dtype), w2_ref[...],
                preferred_element_type=jnp.float32)
    y = y + b2_ref[...].astype(jnp.float32)
    # dropout (eval mode) == identity; residual add in f32; single cast at store.
    o_ref[...] = (y + x.astype(jnp.float32)).astype(o_ref.dtype)


def ffn_kernel_tiled(x_ref, w1_ref, b1_ref, w2_ref, b2_ref, o_ref,
                     acc_ref, xc_ref):
    """Streaming path: intermediate dim tiled over grid axis 1 (reduction)."""
    k = pl.program_id(1)

    @pl.when(k == 0)
    def _cast_x():
        # Hoist the compute-dtype cast of x: done once per token tile.
        xc_ref[...] = x_ref[...].astype(xc_ref.dtype)

    h = jnp.dot(xc_ref[...], w1_ref[...], preferred_element_type=jnp.float32)
    h = jnp.tanh(h + b1_ref[...].astype(jnp.float32))
    partial = jnp.dot(h.astype(w2_ref.dtype), w2_ref[...],
                      preferred_element_type=jnp.float32)

    @pl.when(k == 0)
    def _first():
        acc_ref[...] = partial          # direct write: no zero-fill, no RMW

    @pl.when(k > 0)
    def _accum():
        acc_ref[...] += partial

    @pl.when(k == pl.num_programs(1) - 1)
    def _epilogue():
        y = acc_ref[...] + b2_ref[...].astype(jnp.float32)
        # dropout (eval mode) == identity; residual in f32, single cast at store.
        o_ref[...] = (y + x_ref[...].astype(jnp.float32)).astype(o_ref.dtype)


# --------------------------------------------------------------------------- #
# Host-side helpers
# --------------------------------------------------------------------------- #
def _round_up(n, m):
    return ((n + m - 1) // m) * m


def _vmem_budget():
    """Per-generation scoped-VMEM cap (leave headroom for compiler scratch)."""
    try:
        phys = int(pltpu.get_tpu_info().vmem_capacity_bytes)
    except Exception:
        phys = 64 << 20          # conservative: assume the smallest (v7x-class)
    if phys <= (64 << 20):
        return 48 << 20          # v7x: 64 MiB physical -> cap well below it
    return 100 << 20             # v5e / v6e: 128 MiB physical


def _vmem_estimate(tm, D, tk, x_isz, w_isz, b_isz, resident):
    """Conservative VMEM bytes: double-buffered operands + temps + scratch."""
    nb = 2                                   # auto-pipeline double buffering
    est = nb * tm * D * x_isz                # x tile
    est += nb * tm * D * x_isz               # out tile
    est += nb * D * tk * w_isz               # W1 chunk
    est += nb * tk * D * w_isz               # W2 chunk
    est += nb * 8 * tk * b_isz               # b1 chunk (sublane padded)
    est += nb * 8 * D * b_isz                # b2
    est += tm * tk * (4 + 4 + w_isz)         # h (f32) + bias bcast + cast copy
    if not resident:
        est += tm * D * 4                    # f32 accumulator scratch
        est += tm * D * w_isz                # hoisted compute-dtype x scratch
    return est


def _pick_tk(D, inter, tm, x_isz, w_isz, b_isz, budget):
    """Pick the intermediate-dim chunk: full residency if it fits, else the
    largest lane-aligned divisor of `inter` that fits (prefer 512-multiples)."""
    if inter % 128 != 0:
        # (8,128) lane rule forces the chunk to equal the full dim.
        # TODO(synk): pad the intermediate dim instead for odd sizes.
        return inter
    if _vmem_estimate(tm, D, inter, x_isz, w_isz, b_isz, True) <= budget:
        return inter                                      # weight-resident path
    divisors = [d for d in range(128, inter, 128) if inter % d == 0]
    for pref in (512, 256, 128):                          # MXU-friendly first
        cand = [d for d in divisors if d % pref == 0 and
                _vmem_estimate(tm, D, d, x_isz, w_isz, b_isz, False) <= budget]
        if cand:
            return max(cand)
    return min(divisors) if divisors else inter           # best effort


# --------------------------------------------------------------------------- #
# Wrapper
# --------------------------------------------------------------------------- #
def ffn_block(x, w1, b1, w2, b2, *, tm=None, tk=None, compute_dtype=None,
              vmem_limit_bytes=None):
    """FfnBlock forward.  x: [B, S, D] -> [B, S, D].

    w1: [D, 4D], b1: [4D], w2: [4D, D], b2: [D]   ("x @ W + b" convention,
    i.e. transpose of PyTorch nn.Linear weight storage).
    compute_dtype=jnp.bfloat16 casts the weights so both matmuls run on the
    MXU in bf16 (f32 accumulation); bias/tanh/residual stay f32.
    """
    B, S, D = x.shape
    inter = w1.shape[1]
    assert w1.shape == (D, inter) and w2.shape == (inter, D)
    assert b1.shape == (inter,) and b2.shape == (D,)

    if compute_dtype is not None:
        w1 = w1.astype(compute_dtype)
        w2 = w2.astype(compute_dtype)

    N = B * S
    x2 = x.reshape(N, D)
    b1_2d = b1.reshape(1, inter)
    b2_2d = b2.reshape(1, D)

    x_isz = x2.dtype.itemsize
    w_isz = w1.dtype.itemsize
    b_isz = b1_2d.dtype.itemsize

    budget = vmem_limit_bytes if vmem_limit_bytes is not None else _vmem_budget()

    # Token tile: per-generation default (512 on 64 MiB parts, 1024 on 128 MiB
    # parts); clamp so small inputs still yield >= 2 grid rows for megacore.
    if tm is None:
        tm = 512 if budget <= (56 << 20) else 1024
    assert tm % 128 == 0, "token tile must be a multiple of 128"
    tm_eff = min(tm, max(128, _round_up(pl.cdiv(N, 2), 128)))

    if tk is None:
        tk = _pick_tk(D, inter, tm_eff, x_isz, w_isz, b_isz, budget)
    assert inter % tk == 0, "intermediate dim must be divisible by tk"
    assert tk % 128 == 0 or tk == inter, "tk must be lane-aligned (or == 4*dim)"
    num_k = inter // tk
    resident = (num_k == 1)

    est = _vmem_estimate(tm_eff, D, tk, x_isz, w_isz, b_isz, resident)
    if vmem_limit_bytes is None:
        vmem_limit_bytes = min(budget, max(int(1.25 * est), 32 << 20))

    num_i = pl.cdiv(N, tm_eff)   # ragged last block handled by Pallas (no pad)

    if resident:
        grid_spec = pltpu.PrefetchScalarGridSpec(
            num_scalar_prefetch=0,
            grid=(num_i,),
            in_specs=[
                pl.BlockSpec((tm_eff, D), lambda i: (i, 0)),     # x tile
                pl.BlockSpec((D, inter), lambda i: (0, 0)),      # W1 (resident)
                pl.BlockSpec((1, inter), lambda i: (0, 0)),      # b1
                pl.BlockSpec((inter, D), lambda i: (0, 0)),      # W2 (resident)
                pl.BlockSpec((1, D), lambda i: (0, 0)),          # b2
            ],
            out_specs=pl.BlockSpec((tm_eff, D), lambda i: (i, 0)),
        )
        kernel = ffn_kernel_resident
        dims = ("parallel",)
    else:
        grid_spec = pltpu.PrefetchScalarGridSpec(
            num_scalar_prefetch=0,
            grid=(num_i, num_k),
            in_specs=[
                pl.BlockSpec((tm_eff, D), lambda i, k: (i, 0)),  # x tile
                pl.BlockSpec((D, tk), lambda i, k: (0, k)),      # W1 chunk
                pl.BlockSpec((1, tk), lambda i, k: (0, k)),      # b1 chunk
                pl.BlockSpec((tk, D), lambda i, k: (k, 0)),      # W2 chunk
                pl.BlockSpec((1, D), lambda i, k: (0, 0)),       # b2
            ],
            out_specs=pl.BlockSpec((tm_eff, D), lambda i, k: (i, 0)),
            scratch_shapes=[
                pltpu.VMEM((tm_eff, D), jnp.float32),            # f32 accumulator
                pltpu.VMEM((tm_eff, D), w1.dtype),               # hoisted x cast
            ],
        )
        kernel = ffn_kernel_tiled
        dims = ("parallel", "arbitrary")

    out = pl.pallas_call(
        kernel,
        out_shape=jax.ShapeDtypeStruct((N, D), x.dtype),
        grid_spec=grid_spec,
        compiler_params=pltpu.CompilerParams(
            dimension_semantics=dims,
            vmem_limit_bytes=vmem_limit_bytes),
    )(x2, w1, b1_2d, w2, b2_2d)
    return out.reshape(B, S, D)


# --------------------------------------------------------------------------- #
# Reference + init
# --------------------------------------------------------------------------- #
def init_params(key, dim, dtype=jnp.float32):
    """Deterministic init mirroring nn.Linear's U(-1/sqrt(fan_in), 1/sqrt(fan_in))."""
    inter = 4 * dim
    k1, k2, k3, k4 = jax.random.split(key, 4)
    lim1 = 1.0 / jnp.sqrt(dim)
    lim2 = 1.0 / jnp.sqrt(inter)
    w1 = jax.random.uniform(k1, (dim, inter), dtype, -lim1, lim1)
    b1 = jax.random.uniform(k2, (inter,), dtype, -lim1, lim1)
    w2 = jax.random.uniform(k3, (inter, dim), dtype, -lim2, lim2)
    b2 = jax.random.uniform(k4, (dim,), dtype, -lim2, lim2)
    return w1, b1, w2, b2


def ffn_ref(x, w1, b1, w2, b2):
    h = jnp.tanh(x @ w1 + b1)
    y = h @ w2 + b2
    return y + x        # dropout is identity in eval mode


if __name__ == "__main__":
    # Small, lane-dense shapes: N = B*S = 512 tokens, D = 128, inter = 512.
    B, S, D = 4, 128, 128
    key = jax.random.PRNGKey(0)
    kx, kp = jax.random.split(key)
    x = jax.random.normal(kx, (B, S, D), jnp.float32)
    w1, b1, w2, b2 = init_params(kp, D)
    ref = ffn_ref(x, w1, b1, w2, b2)

    # 1) Default path: weights fit VMEM -> weight-resident fast path (num_k == 1).
    out = jax.block_until_ready(ffn_block(x, w1, b1, w2, b2))
    assert out.shape == (B, S, D)
    assert jnp.allclose(out, ref, atol=1e-3, rtol=1e-3), "resident f32 mismatch"

    # 2) Forced reduction tiling (tk=128) exercises the accumulator/streaming path.
    out_tiled = jax.block_until_ready(ffn_block(x, w1, b1, w2, b2, tk=128))
    assert jnp.allclose(out_tiled, ref, atol=1e-3, rtol=1e-3), "tiled f32 mismatch"

    # 3) bf16 MXU compute path (production recommendation), f32 epilogue.
    out_bf16 = jax.block_until_ready(
        ffn_block(x, w1, b1, w2, b2, compute_dtype=jnp.bfloat16))
    ref_bf16 = ffn_ref(x, w1.astype(jnp.bfloat16).astype(jnp.float32), b1,
                       w2.astype(jnp.bfloat16).astype(jnp.float32), b2)
    assert jnp.allclose(out_bf16, ref_bf16, atol=5e-2, rtol=5e-2), "bf16 mismatch"

    # 4) Ragged token count (N=160, not a multiple of the token tile):
    #    no host-side padding, Pallas masks the partial last block.
    xs = x[:, :40]
    out_tail = jax.block_until_ready(ffn_block(xs, w1, b1, w2, b2))
    assert jnp.allclose(out_tail, ffn_ref(xs, w1, b1, w2, b2),
                        atol=1e-3, rtol=1e-3), "ragged-tail mismatch"

    print("KERNEL_OK")
</pallas_src>

<mosaic_0001>
module attributes {stable_mosaic.version = 11 : i64} {
  func.func @ffn_kernel_resident(%arg0: i32, %arg1: memref<256x128xf32, #tpu.memory_space<vmem>>, %arg2: memref<128x512xf32, #tpu.memory_space<vmem>>, %arg3: memref<1x512xf32, #tpu.memory_space<vmem>>, %arg4: memref<512x128xf32, #tpu.memory_space<vmem>>, %arg5: memref<1x128xf32, #tpu.memory_space<vmem>>, %arg6: memref<256x128xf32, #tpu.memory_space<vmem>>) attributes {dimension_semantics = [#tpu.dimension_semantics<parallel>], iteration_bounds = array<i64: 2>, scalar_prefetch = 0 : i64, scratch_operands = 0 : i64, tpu.core_type = #tpu.core_type<tc>, window_params = [{transform_indices = @transform_0, window_bounds = array<i64: 256, 128>}, {pipeline_mode = #tpu.pipeline_mode<synchronous>, transform_indices = @transform_1, window_bounds = array<i64: 128, 512>}, {pipeline_mode = #tpu.pipeline_mode<synchronous>, transform_indices = @transform_2, window_bounds = array<i64: 1, 512>}, {pipeline_mode = #tpu.pipeline_mode<synchronous>, transform_indices = @transform_3, window_bounds = array<i64: 512, 128>}, {pipeline_mode = #tpu.pipeline_mode<synchronous>, transform_indices = @transform_4, window_bounds = array<i64: 1, 128>}, {transform_indices = @transform_5, window_bounds = array<i64: 256, 128>}]} {
    %c0 = arith.constant 0 : index
    %c0_0 = arith.constant 0 : index
    %0 = vector.load %arg1[%c0, %c0_0] : memref<256x128xf32, #tpu.memory_space<vmem>>, vector<256x128xf32>
    %c0_1 = arith.constant 0 : index
    %c0_2 = arith.constant 0 : index
    %1 = vector.load %arg2[%c0_1, %c0_2] : memref<128x512xf32, #tpu.memory_space<vmem>>, vector<128x512xf32>
    %cst = arith.constant dense<0.000000e+00> : vector<256x512xf32>
    %2 = tpu.matmul %0, %1, %cst {dimension_numbers = #tpu.dot_dimension_numbers<[1], [0], [0], [1], [0, 0, 1, 1], [], []>} : vector<256x128xf32>, vector<128x512xf32>, vector<256x512xf32> -> vector<256x512xf32>
    %c0_3 = arith.constant 0 : index
    %c0_4 = arith.constant 0 : index
    %3 = vector.load %arg3[%c0_3, %c0_4] : memref<1x512xf32, #tpu.memory_space<vmem>>, vector<1x512xf32>
    %4 = vector.broadcast %3 : vector<1x512xf32> to vector<256x512xf32>
    %5 = arith.addf %2, %4 : vector<256x512xf32>
    %6 = math.tanh %5 : vector<256x512xf32>
    %c0_5 = arith.constant 0 : index
    %c0_6 = arith.constant 0 : index
    %7 = vector.load %arg4[%c0_5, %c0_6] : memref<512x128xf32, #tpu.memory_space<vmem>>, vector<512x128xf32>
    %cst_7 = arith.constant dense<0.000000e+00> : vector<256x128xf32>
    %8 = tpu.matmul %6, %7, %cst_7 {dimension_numbers = #tpu.dot_dimension_numbers<[1], [0], [0], [1], [0, 0, 1, 1], [], []>} : vector<256x512xf32>, vector<512x128xf32>, vector<256x128xf32> -> vector<256x128xf32>
    %c0_8 = arith.constant 0 : index
    %c0_9 = arith.constant 0 : index
    %9 = vector.load %arg5[%c0_8, %c0_9] : memref<1x128xf32, #tpu.memory_space<vmem>>, vector<1x128xf32>
    %10 = vector.broadcast %9 : vector<1x128xf32> to vector<256x128xf32>
    %11 = arith.addf %8, %10 : vector<256x128xf32>
    %12 = arith.addf %11, %0 : vector<256x128xf32>
    %c0_10 = arith.constant 0 : index
    %c0_11 = arith.constant 0 : index
    %13 = vector.load %arg6[%c0_10, %c0_11] : memref<256x128xf32, #tpu.memory_space<vmem>>, vector<256x128xf32>
    tpu.vector_store %arg6[%c0_10, %c0_11], %12 {strides = array<i32>} : memref<256x128xf32, #tpu.memory_space<vmem>>, vector<256x128xf32>,
    return
  }
  func.func @transform_0(%arg0: i32) -> (i32, i32) {
    %c0_i32 = arith.constant 0 : i32
    %c0_i32_0 = arith.constant 0 : i32
    return %arg0, %c0_i32 : i32, i32
  }
  func.func @transform_1(%arg0: i32) -> (i32, i32) {
    %c0_i32 = arith.constant 0 : i32
    %c0_i32_0 = arith.constant 0 : i32
    %c0_i32_1 = arith.constant 0 : i32
    return %c0_i32, %c0_i32_0 : i32, i32
  }
  func.func @transform_2(%arg0: i32) -> (i32, i32) {
    %c0_i32 = arith.constant 0 : i32
    %c0_i32_0 = arith.constant 0 : i32
    %c0_i32_1 = arith.constant 0 : i32
    return %c0_i32, %c0_i32_0 : i32, i32
  }
  func.func @transform_3(%arg0: i32) -> (i32, i32) {
    %c0_i32 = arith.constant 0 : i32
    %c0_i32_0 = arith.constant 0 : i32
    %c0_i32_1 = arith.constant 0 : i32
    return %c0_i32, %c0_i32_0 : i32, i32
  }
  func.func @transform_4(%arg0: i32) -> (i32, i32) {
    %c0_i32 = arith.constant 0 : i32
    %c0_i32_0 = arith.constant 0 : i32
    %c0_i32_1 = arith.constant 0 : i32
    return %c0_i32, %c0_i32_0 : i32, i32
  }
  func.func @transform_5(%arg0: i32) -> (i32, i32) {
    %c0_i32 = arith.constant 0 : i32
    %c0_i32_0 = arith.constant 0 : i32
    return %arg0, %c0_i32 : i32, i32
  }
}

</mosaic_0001>

<bundles_post_ra>
// kernel: tpu_custom_call.1
= control target key start
LH: loop header
LB: loop body
LE: loop exit
PB: predicated region body
PF: predicated region fallthrough
CT: control target
= control target key end

     0   :  { %10 = vsyncpa [#allocation3], 0  ;;  %s3086_s0 = inlined_call_operand.hbm [shape: f32[512,128], index: 0, kind: input, shape index: {}]   ;;  %s3087_s1 = inlined_call_operand.hbm [shape: f32[128,512], index: 1, kind: input, shape index: {}]   ;;  %s3088_s2 = inlined_call_operand.vmem [shape: f32[1,512], index: 2, kind: input, shape index: {}]   ;;  %s3089_s3 = inlined_call_operand.hbm [shape: f32[512,128], index: 3, kind: input, shape index: {}]   ;;  %s3090_s4 = inlined_call_operand.vmem [shape: f32[1,128], index: 4, kind: input, shape index: {}]   ;;  %s3091_s5 = inlined_call_operand.hbm [shape: f32[512,128], index: 5, kind: output, shape index: {}]  }
   0x1   :  { %12 = vsyncpa [#allocation3 + $0x1], 0 }
   0x2   :  { %13 = vsyncpa [#allocation6], 0 }
   0x3   :  { %14 = vsyncpa [#allocation4], 0 }
   0x4   :  { %16 = vsyncpa [#allocation4 + $0x1], 0  ;;  %s2469_s18 = smov 0   ;;  %s2471_s19 = smov 0  }
   0x5   :  { %s2473_s20 = smov 0   ;;  %s2475_s21 = smov 0  }
   0x6 LB: > { %s2490_s22 = sadd.s32 4294967295, %s2425_s21   ;;  %s1725_s23 = sadd.s32 4294967294, %s2425_s21   ;;  %s2425_s21 = sphi %s2475_s21, %s3111_s21   ;;  %s2421_s20 = sphi %s2473_s20, %s3110_s20   ;;  %s2417_s19 = sphi %s2471_s19, %s3109_s19   ;;  %s2413_s18 = sphi %s2469_s18, %s3108_s18  }
   0x7   : > { %p42_p0 = scmp.ne.s32.totalorder %s2417_s19, %s2413_s18  ;;  %p3092_p1 = scmp.eq.s32.totalorder %s2490_s22, 0 }
   0x8   : > { %p156_p3 = scmp.eq.s32.totalorder %s1725_s23, 1  ;;  %p1726_p5 = scmp.ge.s32.totalorder %s2425_s21, 1 }
   0x9   : > { %p2499_p4 = por %p3092_p1, %p42_p0  ;;  %p163_p7 = scmp.lt.s32.totalorder %s2425_s21, 3 }
   0xa   : > { %p2504_p6 = por %p156_p3, %p42_p0  ;;  %s2427_s27 = smov [#allocation5]  }
   0xb   : > { %s3095_s24 = scalar_select %p2499_p4, 1, 0 }
   0xc   : > { %s3096_s25 = scalar_select %p2504_p6, 1, 0 }
   0xd   : > { %p2509_p8 = pnand %p1726_p5, %p163_p7  ;;  %s175_s28 = sshll.u32 %s2427_s27, 4  ;;  %s2513_s28 = int_to_ptr.vmem [resolvable:$true] %s175_s28 }
   0xe   : > { %s2428_s30 = smov [#allocation7]   ;;  %s2269_s9 = scalar_lea.hbm %s3087_s1, 8192 }
   0xf   : > { %p1918_p9 = pneg %p2509_p8  ;;  %s191_s6 = sshll.u32 %s2428_s30, 4  ;;  %s2524_s6 = int_to_ptr.vmem [resolvable:$true] %s191_s6 }
  0x10   : > { %p2270_p12 = scmp.ne.s32.totalorder %s3087_s1, %s2269_s9  ;;  %p2276_p5 = scmp.lt.u32.totalorder %s2269_s9, %s3087_s1 }
  0x11   : > { %p2520_p11 = pnand %p1918_p9, %p3092_p1 }
  0x13   : > { %p2271_p13 = pneg %p2520_p11 }
  0x15   : > { %p2272_p0 = pnand %p2271_p13, %p2270_p12 }
  0x17   : > { %p2273_p3 = pneg %p2272_p0 }
  0x19   : > { %p2278_p7 = pnand %p2276_p5, %p2273_p3 }
  0x1b   : > { %2281 = shalt.err (!%p2278_p7)
}
  0x1c   : > { %s2282_s14 = scalar_lea.vmem %s2513_s28, 8192  ;;  %p2290_p2 = scmp.lt.s32.totalorder %s2513_s28, %s2513_s28 }
  0x1d   : > { %p2283_p9 = scmp.ne.s32.totalorder %s2513_s28, %s2282_s14  ;;  %p2291_p12 = scmp.lt.s32.totalorder %s2282_s14, %s2282_s14 }
  0x1f   : > { %p2285_p10 = pnand %p2283_p9, %p2271_p13  ;;  %p2292_p0 = por %p2291_p12, %p2290_p2 }
  0x21   : > { %p2286_p1 = pneg %p2285_p10 }
  0x23   : > { %p2293_p6 = pnand %p2292_p0, %p2286_p1 }
  0x25   : > { %2296 = shalt.err (!%p2293_p6)
}
  0x26   : > { %s2429_s15 = smov 512   ;;  %s2430_s16 = smov 32  }
  0x27   : > { %1921 = dma.hbm_to_vmem [thread:$0]  (!%p2520_p11), %s3087_s1, 8192, %s2513_s28, [#allocation6], %s2429_s15, %s2429_s15, %s2430_s16  }
  0x28   : > { %s2297_s7 = scalar_lea.hbm %s3089_s3, 8192 }
  0x29   : > { %p2298_p2 = scmp.ne.s32.totalorder %s3089_s3, %s2297_s7  ;;  %p2304_p10 = scmp.lt.u32.totalorder %s2297_s7, %s3089_s3 }
  0x2b   : > { %p2300_p1 = pnand %p2298_p2, %p2271_p13 }
  0x2d   : > { %p2301_p6 = pneg %p2300_p1 }
  0x2f   : > { %p2306_p3 = pnand %p2304_p10, %p2301_p6 }
  0x31   : > { %2309 = shalt.err (!%p2306_p3)
}
  0x32   : > { %s2310_s28 = scalar_lea.vmem %s2524_s6, 8192  ;;  %p2318_p12 = scmp.lt.s32.totalorder %s2524_s6, %s2524_s6 }
  0x33   : > { %p2311_p5 = scmp.ne.s32.totalorder %s2524_s6, %s2310_s28  ;;  %p2319_p0 = scmp.lt.s32.totalorder %s2310_s28, %s2310_s28 }
  0x35   : > { %p2313_p7 = pnand %p2311_p5, %p2271_p13  ;;  %p2320_p2 = por %p2319_p0, %p2318_p12 }
  0x37   : > { %p2314_p9 = pneg %p2313_p7 }
  0x39   : > { %p2321_p1 = pnand %p2320_p2, %p2314_p9 }
  0x3b   : > { %2324 = shalt.err (!%p2321_p1)
}
  0x3c   : > { %s2431_s12 = smov 128   ;;  %s2432_s13 = smov 8  }
  0x3d   : > { %1924 = dma.hbm_to_vmem [thread:$0]  (!%p2520_p11), %s3089_s3, 8192, %s2524_s6, [#allocation6], %s2431_s12, %s2431_s12, %s2432_s13  }
  0x3e   : > { %s2582_s16 = sadd.s32 1, %s2425_s21   ;;  %s29_s23 = sadd.s32 1, %s2421_s20 }
  0x3f   : > { %s26_s17 = ssub.s32 %s2425_s21, %s2582_s16  ;;  %p36_p6 = scmp.ne.s32.totalorder %s2421_s20, %s2417_s19 }
  0x40   : > { %p27_p13 = scmp.eq.s32.totalorder %s26_s17, 0  ;;  %p37_p10 = scmp.eq.s32.totalorder %s2425_s21, 0 }
  0x41   : > { %p3099_p5 = scmp.eq.s32.totalorder %s2490_s22, 1  ;;  %p1935_p9 = scmp.lt.s32.totalorder %s2425_s21, 2 }
  0x42   : > { %s2591_s27 = scalar_select %p27_p13, %s2421_s20, %s29_s23  }
  0x43   : > { %p38_p3 = por %p37_p10, %p36_p6  ;;  %p2595_p7 = por %p3099_p5, %p36_p6 }
  0x44   : > { %s208_s30 = sand.u32 1, %s2421_s20   ;;  %s1744_s6 = sshll.u32 %s2425_s21, 12 }
  0x45   : > { %s3100_s29 = scalar_select %p2595_p7, 1, 0 }
  0x46   : > { %s1730_s7 = sshll.u32 %s208_s30, 8  ;;  %s2605_s10 = scalar_lea.hbm %s3086_s0, %s1744_s6 }
  0x47   : > { %s212_s11 = scalar_lea.vmem [#allocation2], %s1730_s7  ;;  %p2609_p11 = pnand %p1935_p9, %p38_p3 }
  0x48   : > { %s219_s28 = sshll.u32 %s212_s11, 4  ;;  %s2613_s15 = scalar_lea.sflag [#allocation3], %s208_s30  ;;  %s2607_s28 = int_to_ptr.vmem [resolvable:$true] %s219_s28 }
  0x49   : > { %s2325_s17 = scalar_lea.hbm %s2605_s10, 4096  ;;  %p2327_p0 = pneg %p2609_p11 }
  0x4a   : > { %p2326_p12 = scmp.ne.s32.totalorder %s2605_s10, %s2325_s17  ;;  %s2330_s6 = scalar_lea.hbm %s3086_s0, 8192 }
  0x4b   : > { %p2331_p13 = scmp.lt.u32.totalorder %s2605_s10, %s3086_s0  ;;  %p2332_p6 = scmp.lt.u32.totalorder %s2330_s6, %s2325_s17 }
  0x4c   : > { %p2328_p2 = pnand %p2327_p0, %p2326_p12  ;;  %p2334_p3 = scmp.lt.u32.totalorder %s2325_s17, %s2605_s10 }
  0x4d   : > { %p2333_p10 = por %p2332_p6, %p2331_p13 }
  0x4e   : > { %p2329_p1 = pneg %p2328_p2 }
  0x4f   : > { %p2335_p5 = por %p2334_p3, %p2333_p10 }
  0x51   : > { %p2336_p9 = pnand %p2335_p5, %p2329_p1 }
  0x53   : > { %2339 = shalt.err (!%p2336_p9)
}
  0x54   : > { %s2340_s30 = scalar_lea.vmem %s2607_s28, 4096  ;;  %s2433_s11 = smov [#allocation2]  }
  0x55   : > { %p2341_p12 = scmp.ne.s32.totalorder %s2607_s28, %s2340_s30  ;;  %s2345_s23 = sshll.u32 %s2433_s11, 4  ;;  %s2346_s23 = int_to_ptr.vmem [resolvable:$false] %s2345_s23 }
  0x56   : > { %s2347_s7 = scalar_lea.vmem %s2346_s23, 8192  ;;  %p2348_p4 = scmp.lt.s32.totalorder %s2607_s28, %s2346_s23 }
  0x57   : > { %p2343_p2 = pnand %p2341_p12, %p2327_p0  ;;  %p2349_p13 = scmp.lt.s32.totalorder %s2347_s7, %s2340_s30 }
  0x59   : > { %p2344_p7 = pneg %p2343_p2  ;;  %p2350_p6 = por %p2349_p13, %p2348_p4 }
  0x5b   : > { %p2351_p10 = pnand %p2350_p6, %p2344_p7 }
  0x5d   : > { %2354 = shalt.err (!%p2351_p10)
}
  0x5e   : > { %1928 = dma.hbm_to_vmem [thread:$0]  (!%p2609_p11), %s2605_s10, 4096, %s2607_s28, %s2613_s15, %s2431_s12, %s2431_s12, %s2432_s13  }
  0x5f   : > { %231 = sbr.rel (%p2509_p8) target bundleno = 727 (0x2d7), region = 40  ;;  %s2647_s17 = sand.u32 (!%p2509_p8), 1, %s2417_s19  }
  0x60   : > { %s1734_s6 = sshll.u32 (!%p2509_p8), %s2647_s17, 8  ;;  %s234_s8 = scalar_lea.sflag (!%p2509_p8), [#allocation3], %s2647_s17 }
  0x61   : > { %s2653_s14 = scalar_lea.vmem (!%p2509_p8), [#allocation2], %s1734_s6  ;;  %p3102_p4 = scmp.ne.s32.totalorder (!%p2509_p8), %s3095_s24, 0 }
  0x66   : > { %2400 = dma.done.wait (%p3102_p4), %s234_s8, 4096  }
  0x67   : > { %2402 = vsyncadd (%p3102_p4), %s234_s8, 4294963200  ;;  %p3103_p7 = scmp.eq.s32.totalorder %s2490_s22, 0 }
  0x69   : > { %2404 = dma.done.wait (%p3103_p7), [#allocation6], 16384   ;;  %p3104_p8 = pmov %p3103_p7 }
  0x6a   : > { %v2434_v0 = vmov 0.0   ;;  %v307_v1 = vld [vmem:[#allocation5 + $0x8] sm:$0xff]  ;;  %v309_v3 = vld [vmem:[#allocation5 + $0x18] sm:$0xff]  ;;  %v306_v6 = vld [vmem:[#allocation5] sm:$0xff]  ;;  %s2940_s10 = scalar_lea.vmem [#allocation8], %s1734_s6  ;;  %s1745_s28 = sshll.u32 %s2490_s22, 12 }
  0x6b   : > { %2406 = vsyncadd (%p3104_p8), [#allocation6], 4294950912  ;;  %456 = vmatprep.mubr.f32.mxu0 %v2434_v0  ;;  %713 = vmatprep.mubr.f32.mxu1 %v2434_v0  ;;  %v311_v2 = vld [vmem:[#allocation5 + $0x28] sm:$0xff]  ;;  %v313_v5 = vld [vmem:[#allocation5 + $0x38] sm:$0xff]  ;;  %s1633_s15 = sshll.u32 %s2940_s10, 4  ;;  %s3038_s11 = scalar_lea.hbm %s3091_s5, %s1745_s28  ;;  %s3040_s15 = int_to_ptr.vmem [resolvable:$true] %s1633_s15 }
  0x6c   : > { %v1746_v4 = vpack.c.bf16 %v311_v2, %v307_v1  ;;  %v310_v7 = vld [vmem:[#allocation5 + $0x20] sm:$0xff]  ;;  %v1778_v8 = vpack.c.bf16 %v313_v5, %v309_v3  ;;  %v308_v10 = vld [vmem:[#allocation5 + $0x10] sm:$0xff]  ;;  %v315_v12 = vld [vmem:[#allocation5 + $0x48] sm:$0xff]  ;;  %s1620_s23 = scalar_lea.sflag [#allocation4], %s2647_s17  ;;  %s2355_s7 = scalar_lea.vmem %s3040_s15, 4096 }
  0x6d   : > { %v1748_v9 = vpack.c.bf16 %v310_v7, %v306_v6  ;;  %v312_v11 = vld [vmem:[#allocation5 + $0x30] sm:$0xff]  ;;  %v319_v14 = vld [vmem:[#allocation5 + $0x68] sm:$0xff]  ;;  %v317_v15 = vld [vmem:[#allocation5 + $0x58] sm:$0xff]  ;;  %p2356_p11 = scmp.ne.s32.totalorder %s3040_s15, %s2355_s7  ;;  %p3105_p0 = scmp.ne.s32.totalorder %s3100_s29, 0 }
  0x6e   : > { %1747 = vmatprep.subr.bf16.mxu0 %v1746_v4  ;;  %v1780_v13 = vpack.c.bf16 %v312_v11, %v308_v10  ;;  %v321_v16 = vld [vmem:[#allocation5 + $0x78] sm:$0xff]  ;;  %1779 = vmatprep.subr.bf16.mxu1 %v1778_v8  ;;  %v1750_v17 = vpack.c.bf16 %v319_v14, %v315_v12  ;;  %v314_v19 = vld [vmem:[#allocation5 + $0x40] sm:$0xff]  ;;  %v316_v21 = vld [vmem:[#allocation5 + $0x50] sm:$0xff]  ;;  %s2436_s22 = smov [#allocation8]  }
  0x6f   : > { %1749 = vmatpush1.bf16.msra.mxu0 %v1748_v9  ;;  %v1782_v18 = vpack.c.bf16 %v321_v16, %v317_v15  ;;  %v318_v20 = vld [vmem:[#allocation5 + $0x60] sm:$0xff]  ;;  %v320_v23 = vld [vmem:[#allocation5 + $0x70] sm:$0xff]  ;;  %v323_v24 = vld [vmem:[#allocation5 + $0x88] sm:$0xff]  ;;  %p2357_p1 = pnand %p2356_p11, %p3105_p0  ;;  %s2359_s6 = sshll.u32 %s2436_s22, 4  ;;  %s2360_s6 = int_to_ptr.vmem [resolvable:$false] %s2359_s6 }
  0x70   : > { %1781 = vmatpush1.bf16.msra.mxu1 %v1780_v13  ;;  %v1752_v22 = vpack.c.bf16 %v318_v20, %v314_v19  ;;  %v327_v25 = vld [vmem:[#allocation5 + $0xa8] sm:$0xff]  ;;  %1751 = vmatprep.subr.bf16.mxu0 %v1750_v17  ;;  %v1784_v26 = vpack.c.bf16 %v320_v23, %v316_v21  ;;  %v325_v28 = vld [vmem:[#allocation5 + $0x98] sm:$0xff]  ;;  %v322_v30 = vld [vmem:[#allocation5 + $0x80] sm:$0xff]  ;;  %s2361_s8 = scalar_lea.vmem %s2360_s6, 8192  ;;  %p2362_p5 = scmp.lt.s32.totalorder %s3040_s15, %s2360_s6 }
  0x71   : > { %1783 = vmatprep.subr.bf16.mxu1 %v1782_v18  ;;  %v1754_v27 = vpack.c.bf16 %v327_v25, %v323_v24  ;;  %v329_v29 = vld [vmem:[#allocation5 + $0xb8] sm:$0xff]  ;;  %v326_v32 = vld [vmem:[#allocation5 + $0xa0] sm:$0xff]  ;;  %v324_v33 = vld [vmem:[#allocation5 + $0x90] sm:$0xff]  ;;  %p2358_p3 = pneg %p2357_p1  ;;  %p2363_p9 = scmp.lt.s32.totalorder %s2361_s8, %s2355_s7 }
  0x72   : > { %v1786_v31 = vpack.c.bf16 %v329_v29, %v325_v28  ;;  %v328_v34 = vld [vmem:[#allocation5 + $0xb0] sm:$0xff]  ;;  %v1756_v35 = vpack.c.bf16 %v326_v32, %v322_v30  ;;  %v331_v36 = vld [vmem:[#allocation5 + $0xc8] sm:$0xff]  ;;  %v333_v38 = vld [vmem:[#allocation5 + $0xd8] sm:$0xff] }
  0x73   : > { %1753 = vmatpush1.bf16.msra.mxu0 %v1752_v22  ;;  %v335_v37 = vld [vmem:[#allocation5 + $0xe8] sm:$0xff]  ;;  %v1788_v39 = vpack.c.bf16 %v328_v34, %v324_v33  ;;  %v337_v41 = vld [vmem:[#allocation5 + $0xf8] sm:$0xff]  ;;  %v330_v42 = vld [vmem:[#allocation5 + $0xc0] sm:$0xff]  ;;  %p2364_p12 = por %p2363_p9, %p2362_p5 }
  0x74   : > { %1785 = vmatpush1.bf16.msra.mxu1 %v1784_v26  ;;  %1755 = vmatprep.subr.bf16.mxu0 %v1754_v27  ;;  %v1758_v40 = vpack.c.bf16 %v335_v37, %v331_v36  ;;  %v334_v43 = vld [vmem:[#allocation5 + $0xe0] sm:$0xff]  ;;  %v1790_v44 = vpack.c.bf16 %v337_v41, %v333_v38  ;;  %v332_v45 = vld [vmem:[#allocation5 + $0xd0] sm:$0xff]  ;;  %v339_v47 = vld [vmem:[#allocation5 + $0x108] sm:$0xff] }
  0x75   : > { %1787 = vmatprep.subr.bf16.mxu1 %v1786_v31  ;;  %v336_v46 = vld [vmem:[#allocation5 + $0xf0] sm:$0xff]  ;;  %v343_v48 = vld [vmem:[#allocation5 + $0x128] sm:$0xff]  ;;  %v341_v49 = vld [vmem:[#allocation5 + $0x118] sm:$0xff]  ;;  %v1760_v51 = vpack.c.bf16 %v334_v43, %v330_v42  ;;  %p2365_p2 = pnand %p2364_p12, %p2358_p3 }
  0x76   : > { %v345_v50 = vld [vmem:[#allocation5 + $0x138] sm:$0xff]  ;;  %v1792_v52 = vpack.c.bf16 %v336_v46, %v332_v45  ;;  %v1762_v53 = vpack.c.bf16 %v343_v48, %v339_v47  ;;  %v338_v54 = vld [vmem:[#allocation5 + $0x100] sm:$0xff]  ;;  %v340_v56 = vld [vmem:[#allocation5 + $0x110] sm:$0xff] }
  0x77   : > { %1757 = vmatpush1.bf16.msra.mxu0 %v1756_v35  ;;  %v342_v55 = vld [vmem:[#allocation5 + $0x120] sm:$0xff]  ;;  %v1794_v57 = vpack.c.bf16 %v345_v50, %v341_v49  ;;  %v344_v58 = vld [vmem:[#allocation5 + $0x130] sm:$0xff]  ;;  %v347_v59 = vld [vmem:[#allocation5 + $0x148] sm:$0xff] }
  0x78   : > { %1789 = vmatpush1.bf16.msra.mxu1 %v1788_v39  ;;  %1759 = vmatprep.subr.bf16.mxu0 %v1758_v40  ;;  %v351_v60 = vld [vmem:[#allocation5 + $0x168] sm:$0xff]  ;;  %v349_v61 = vld [vmem:[#allocation5 + $0x158] sm:$0xff]  ;;  %v1764_v63 = vpack.c.bf16 %v342_v55, %v338_v54  ;;  %v1796_v1 = vpack.c.bf16 %v344_v58, %v340_v56  ;;  %v346_v3 = vld [vmem:[#allocation5 + $0x140] sm:$0xff]  ;;  %v2435_v39 = vmov 0.0|0.0  }
  0x79   : > { %1791 = vmatprep.subr.bf16.mxu1 %v1790_v44  ;;  %v353_v62 = vld [vmem:[#allocation5 + $0x178] sm:$0xff]  ;;  %v1766_v2 = vpack.c.bf16 %v351_v60, %v347_v59  ;;  %v350_v4 = vld [vmem:[#allocation5 + $0x160] sm:$0xff]  ;;  %v348_v5 = vld [vmem:[#allocation5 + $0x150] sm:$0xff] }
  0x7a   : > { %v1798_v6 = vpack.c.bf16 %v353_v62, %v349_v61  ;;  %v352_v7 = vld [vmem:[#allocation5 + $0x170] sm:$0xff]  ;;  %v355_v8 = vld [vmem:[#allocation5 + $0x188] sm:$0xff]  ;;  %v357_v10 = vld [vmem:[#allocation5 + $0x198] sm:$0xff]  ;;  %v1768_v12 = vpack.c.bf16 %v350_v4, %v346_v3 }
  0x7b   : > { %1761 = vmatpush1.bf16.msra.mxu0 %v1760_v51  ;;  %v359_v9 = vld [vmem:[#allocation5 + $0x1a8] sm:$0xff]  ;;  %v361_v11 = vld [vmem:[#allocation5 + $0x1b8] sm:$0xff]  ;;  %v1800_v13 = vpack.c.bf16 %v352_v7, %v348_v5  ;;  %v354_v15 = vld [vmem:[#allocation5 + $0x180] sm:$0xff] }
  0x7c   : > { %1793 = vmatpush1.bf16.msra.mxu1 %v1792_v52  ;;  %1763 = vmatprep.subr.bf16.mxu0 %v1762_v53  ;;  %v1770_v14 = vpack.c.bf16 %v359_v9, %v355_v8  ;;  %v358_v16 = vld [vmem:[#allocation5 + $0x1a0] sm:$0xff]  ;;  %v356_v17 = vld [vmem:[#allocation5 + $0x190] sm:$0xff]  ;;  %v1802_v18 = vpack.c.bf16 %v361_v11, %v357_v10  ;;  %v363_v20 = vld [vmem:[#allocation5 + $0x1c8] sm:$0xff] }
  0x7d   : > { %1795 = vmatprep.subr.bf16.mxu1 %v1794_v57  ;;  %v360_v19 = vld [vmem:[#allocation5 + $0x1b0] sm:$0xff]  ;;  %v367_v21 = vld [vmem:[#allocation5 + $0x1e8] sm:$0xff]  ;;  %v365_v22 = vld [vmem:[#allocation5 + $0x1d8] sm:$0xff]  ;;  %v1772_v24 = vpack.c.bf16 %v358_v16, %v354_v15 }
  0x7e   : > { %v369_v23 = vld [vmem:[#allocation5 + $0x1f8] sm:$0xff]  ;;  %v1804_v25 = vpack.c.bf16 %v360_v19, %v356_v17  ;;  %v1774_v26 = vpack.c.bf16 %v367_v21, %v363_v20  ;;  %v362_v27 = vld [vmem:[#allocation5 + $0x1c0] sm:$0xff]  ;;  %v364_v30 = vld [vmem:[#allocation5 + $0x1d0] sm:$0xff] }
  0x7f   : > { %1765 = vmatpush1.bf16.msra.mxu0 %v1764_v63  ;;  %v366_v28 = vld [vmem:[#allocation5 + $0x1e0] sm:$0xff]  ;;  %v1806_v29 = vpack.c.bf16 %v369_v23, %v365_v22  ;;  %v368_v31 = vld [vmem:[#allocation5 + $0x1f0] sm:$0xff]  ;;  %v1035_v35 = vld [vmem:[#allocation7 + $0x8] sm:$0xff] }
  0x80   : > { %1797 = vmatpush1.bf16.msra.mxu1 %v1796_v1  ;;  %1767 = vmatprep.subr.bf16.mxu0 %v1766_v2  ;;  %v1776_v32 = vpack.c.bf16 %v366_v28, %v362_v27  ;;  %v1808_v33 = vpack.c.bf16 %v368_v31, %v364_v30  ;;  %v1034_v34 = vld [vmem:[#allocation7] sm:$0xff]  ;;  %v1067_v37 = vld [vmem:[#allocation7 + $0x108] sm:$0xff]  ;;  %v1036_v42 = vld [vmem:[#allocation7 + $0x10] sm:$0xff] }
  0x81   : > { %1799 = vmatprep.subr.bf16.mxu1 %v1798_v6  ;;  %v1066_v36 = vld [vmem:[#allocation7 + $0x100] sm:$0xff]  ;;  %v1811_v40 = vpack.c.bf16 %v1035_v35, %v1034_v34  ;;  %v1037_v43 = vld [vmem:[#allocation7 + $0x18] sm:$0xff]  ;;  %v1068_v44 = vld [vmem:[#allocation7 + $0x110] sm:$0xff] }
  0x82   : > { %v274_v38 = vld [vmem:[%s2653_s14] sm:$0xff]  ;;  %v1859_v41 = vpack.c.bf16 %v1067_v37, %v1066_v36  ;;  %v1069_v45 = vld [vmem:[#allocation7 + $0x118] sm:$0xff]  ;;  %v275_v46 = vld [vmem:[%s2653_s14 + $0x8] sm:$0xff]  ;;  %v1814_v47 = vpack.c.bf16 %v1037_v43, %v1036_v42 }
  0x83   : > { %1769 = vmatpush1.bf16.msra.mxu0 %v1768_v12  ;;  %v1862_v48 = vpack.c.bf16 %v1069_v45, %v1068_v44  ;;  %v1038_v49 = vld [vmem:[#allocation7 + $0x20] sm:$0xff]  ;;  %v1039_v50 = vld [vmem:[#allocation7 + $0x28] sm:$0xff]  ;;  %v276_v53 = vld [vmem:[%s2653_s14 + $0x10] sm:$0xff] }
  0x84   : > { %1801 = vmatpush1.bf16.msra.mxu1 %v1800_v13  ;;  %1771 = vmatprep.subr.bf16.mxu0 %v1770_v14  ;;  %v1070_v51 = vld [vmem:[#allocation7 + $0x120] sm:$0xff]  ;;  %v1071_v52 = vld [vmem:[#allocation7 + $0x128] sm:$0xff]  ;;  %v1817_v54 = vpack.c.bf16 %v1039_v50, %v1038_v49  ;;  %v1040_v56 = vld [vmem:[#allocation7 + $0x30] sm:$0xff] }
  0x85   : > { %1803 = vmatprep.subr.bf16.mxu1 %v1802_v18  ;;  %v1865_v55 = vpack.c.bf16 %v1071_v52, %v1070_v51  ;;  %v1041_v57 = vld [vmem:[#allocation7 + $0x38] sm:$0xff]  ;;  %v1072_v58 = vld [vmem:[#allocation7 + $0x130] sm:$0xff]  ;;  %v1042_v63 = vld [vmem:[#allocation7 + $0x40] sm:$0xff] }
  0x86   : > { %v1073_v59 = vld [vmem:[#allocation7 + $0x138] sm:$0xff]  ;;  %v1820_v61 = vpack.c.bf16 %v1041_v57, %v1040_v56  ;;  %v1043_v1 = vld [vmem:[#allocation7 + $0x48] sm:$0xff]  ;;  %v1074_v2 = vld [vmem:[#allocation7 + $0x140] sm:$0xff] }
  0x87   : > { %1773 = vmatpush1.bf16.msra.mxu0 %v1772_v24  ;;  %v277_v60 = vld [vmem:[%s2653_s14 + $0x18] sm:$0xff]  ;;  %v1868_v62 = vpack.c.bf16 %v1073_v59, %v1072_v58  ;;  %v1075_v3 = vld [vmem:[#allocation7 + $0x148] sm:$0xff]  ;;  %v278_v4 = vld [vmem:[%s2653_s14 + $0x20] sm:$0xff]  ;;  %v1823_v5 = vpack.c.bf16 %v1043_v1, %v1042_v63 }
  0x88   : > { %1805 = vmatpush1.bf16.msra.mxu1 %v1804_v25  ;;  %1775 = vmatprep.subr.bf16.mxu0 %v1774_v26  ;;  %v1871_v6 = vpack.c.bf16 %v1075_v3, %v1074_v2  ;;  %v1044_v7 = vld [vmem:[#allocation7 + $0x50] sm:$0xff]  ;;  %v1045_v8 = vld [vmem:[#allocation7 + $0x58] sm:$0xff]  ;;  %v279_v11 = vld [vmem:[%s2653_s14 + $0x28] sm:$0xff] }
  0x89   : > { %1807 = vmatprep.subr.bf16.mxu1 %v1806_v29  ;;  %v1076_v9 = vld [vmem:[#allocation7 + $0x150] sm:$0xff]  ;;  %v1077_v10 = vld [vmem:[#allocation7 + $0x158] sm:$0xff]  ;;  %v1826_v12 = vpack.c.bf16 %v1045_v8, %v1044_v7  ;;  %v1046_v14 = vld [vmem:[#allocation7 + $0x60] sm:$0xff] }
  0x8a   : > { %v1874_v13 = vpack.c.bf16 %v1077_v10, %v1076_v9  ;;  %v1047_v15 = vld [vmem:[#allocation7 + $0x68] sm:$0xff]  ;;  %v1078_v16 = vld [vmem:[#allocation7 + $0x160] sm:$0xff]  ;;  %v280_v18 = vld [vmem:[%s2653_s14 + $0x30] sm:$0xff] }
  0x8b   : > { %1777 = vmatpush1.bf16.msra.mxu0 %v1776_v32  ;;  %v1079_v17 = vld [vmem:[#allocation7 + $0x168] sm:$0xff]  ;;  %v1829_v19 = vpack.c.bf16 %v1047_v15, %v1046_v14  ;;  %v1048_v21 = vld [vmem:[#allocation7 + $0x70] sm:$0xff]  ;;  %v1049_v22 = vld [vmem:[#allocation7 + $0x78] sm:$0xff] }
  0x8c   : > { %1809 = vmatpush1.bf16.msra.mxu1 %v1808_v33  ;;  %1810 = vmatprep.subr.bf16.mxu0 %v2435_v39  ;;  %v1877_v20 = vpack.c.bf16 %v1079_v17, %v1078_v16  ;;  %v1080_v23 = vld [vmem:[#allocation7 + $0x170] sm:$0xff]  ;;  %v1081_v24 = vld [vmem:[#allocation7 + $0x178] sm:$0xff]  ;;  %v1832_v26 = vpack.c.bf16 %v1049_v22, %v1048_v21  ;;  %v1050_v28 = vld [vmem:[#allocation7 + $0x80] sm:$0xff] }
  0x8d   : > { %1858 = vmatprep.subr.bf16.mxu1 %v2435_v39  ;;  %v281_v25 = vld [vmem:[%s2653_s14 + $0x38] sm:$0xff]  ;;  %v1880_v27 = vpack.c.bf16 %v1081_v24, %v1080_v23  ;;  %v1051_v29 = vld [vmem:[#allocation7 + $0x88] sm:$0xff]  ;;  %v1082_v30 = vld [vmem:[#allocation7 + $0x180] sm:$0xff] }
  0x8e   : > { %457 = vmatmul.mubr.f32.vlgmr.msra.gmra.mrb[0].mxu0 %v274_v38  ;;  %v1083_v31 = vld [vmem:[#allocation7 + $0x188] sm:$0xff]  ;;  %v282_v32 = vld [vmem:[%s2653_s14 + $0x40] sm:$0xff]  ;;  %v1835_v33 = vpack.c.bf16 %v1051_v29, %v1050_v28  ;;  %v1052_v35 = vld [vmem:[#allocation7 + $0x90] sm:$0xff] }
  0x8f   : > { %714 = vmatmul.mubr.f32.vlgmr.msra.gmra.mrb[0].mxu1 %v274_v38  ;;  %462 = vmatprep.mubr.f32.mxu0 %v2434_v0  ;;  %v1883_v34 = vpack.c.bf16 %v1083_v31, %v1082_v30  ;;  %v1053_v36 = vld [vmem:[#allocation7 + $0x98] sm:$0xff]  ;;  %v1084_v37 = vld [vmem:[#allocation7 + $0x190] sm:$0xff]  ;;  %v1054_v43 = vld [vmem:[#allocation7 + $0xa0] sm:$0xff] }
  0x90   : > { %719 = vmatprep.mubr.f32.mxu1 %v2434_v0  ;;  %1812 = vmatpush1.bf16.msra.mxu0 %v1811_v40  ;;  %v1085_v38 = vld [vmem:[#allocation7 + $0x198] sm:$0xff]  ;;  %v283_v40 = vld [vmem:[%s2653_s14 + $0x48] sm:$0xff]  ;;  %v1086_v45 = vld [vmem:[#allocation7 + $0x1a0] sm:$0xff] }
  0x91   : > { %1860 = vmatpush1.bf16.msra.mxu1 %v1859_v41  ;;  %1813 = vmatprep.subr.bf16.mxu0 %v2435_v39  ;;  %v1838_v41 = vpack.c.bf16 %v1053_v36, %v1052_v35  ;;  %v1886_v42 = vpack.c.bf16 %v1085_v38, %v1084_v37  ;;  %v1055_v44 = vld [vmem:[#allocation7 + $0xa8] sm:$0xff]  ;;  %v1056_v50 = vld [vmem:[#allocation7 + $0xb0] sm:$0xff]  ;;  %v1057_v51 = vld [vmem:[#allocation7 + $0xb8] sm:$0xff]  ;;  %v372_v37 = vlaneseq }
  0x92   : > { %463 = vmatmul.mubr.f32.gmra.mrb[2].mxu0 %v275_v46  ;;  %1861 = vmatprep.subr.bf16.mxu1 %v2435_v39  ;;  %v1088_v52 = vld [vmem:[#allocation7 + $0x1b0] sm:$0xff]  ;;  %v1058_v57 = vld [vmem:[#allocation7 + $0xc0] sm:$0xff]  ;;  %v1059_v58 = vld [vmem:[#allocation7 + $0xc8] sm:$0xff] }
  0x93   : > { %720 = vmatmul.mubr.f32.gmra.mrb[2].mxu1 %v275_v46  ;;  %468 = vmatprep.mubr.f32.mxu0 %v2434_v0  ;;  %v1087_v46 = vld [vmem:[#allocation7 + $0x1a8] sm:$0xff]  ;;  %v1090_v59 = vld [vmem:[#allocation7 + $0x1c0] sm:$0xff]  ;;  %v1060_v1 = vld [vmem:[#allocation7 + $0xd0] sm:$0xff]  ;;  %v373_v38 = vshrl.u32 %v372_v37, 7 }
  0x94   : > { %725 = vmatprep.mubr.f32.mxu1 %v2434_v0  ;;  %1815 = vmatpush1.bf16.msra.mxu0 %v1814_v47  ;;  %v284_v47 = vld [vmem:[%s2653_s14 + $0x50] sm:$0xff]  ;;  %v1889_v49 = vpack.c.bf16 %v1087_v46, %v1086_v45  ;;  %v1061_v2 = vld [vmem:[#allocation7 + $0xd8] sm:$0xff]  ;;  %v290_v10 = vld [vmem:[%s2653_s14 + $0x80] sm:$0xff] }
  0x95   : > { %1863 = vmatpush1.bf16.msra.mxu1 %v1862_v48  ;;  %1816 = vmatprep.subr.bf16.mxu0 %v2435_v39  ;;  %v1841_v48 = vpack.c.bf16 %v1055_v44, %v1054_v43  ;;  %v1092_v3 = vld [vmem:[#allocation7 + $0x1d0] sm:$0xff]  ;;  %v289_v9 = vld [vmem:[%s2653_s14 + $0x78] sm:$0xff]  ;;  %v294_v14 = vld [vmem:[%s2653_s14 + $0xa0] sm:$0xff]  ;;  %v378_v43 = vsub.s32 1, %v373_v38  ;;  %v386_v44 = vsub.s32 3, %v373_v38 }
  0x96   : > { %469 = vmatmul.mubr.f32.gmra.mrb[4].mxu0 %v276_v53  ;;  %1864 = vmatprep.subr.bf16.mxu1 %v2435_v39  ;;  %v288_v8 = vld [vmem:[%s2653_s14 + $0x70] sm:$0xff]  ;;  %v295_v15 = vld [vmem:[%s2653_s14 + $0xa8] sm:$0xff]  ;;  %v1062_v17 = vld [vmem:[#allocation7 + $0xe0] sm:$0xff] }
  0x97   : > { %726 = vmatmul.mubr.f32.gmra.mrb[4].mxu1 %v276_v53  ;;  %474 = vmatprep.mubr.f32.mxu0 %v2434_v0  ;;  %v1089_v53 = vld [vmem:[#allocation7 + $0x1b8] sm:$0xff]  ;;  %v296_v16 = vld [vmem:[%s2653_s14 + $0xb0] sm:$0xff]  ;;  %v1094_v21 = vld [vmem:[#allocation7 + $0x1e0] sm:$0xff] }
  0x98   : > { %731 = vmatprep.mubr.f32.mxu1 %v2434_v0  ;;  %1818 = vmatpush1.bf16.msra.mxu0 %v1817_v54  ;;  %v285_v54 = vld [vmem:[%s2653_s14 + $0x58] sm:$0xff]  ;;  %v1892_v56 = vpack.c.bf16 %v1089_v53, %v1088_v52  ;;  %v1095_v22 = vld [vmem:[#allocation7 + $0x1e8] sm:$0xff]  ;;  %v298_v24 = vld [vmem:[%s2653_s14 + $0xc0] sm:$0xff] }
  0x99   : > { %1866 = vmatpush1.bf16.msra.mxu1 %v1865_v55  ;;  %1819 = vmatprep.subr.bf16.mxu0 %v2435_v39  ;;  %v1844_v55 = vpack.c.bf16 %v1057_v51, %v1056_v50  ;;  %v1901_v23 = vpack.c.bf16 %v1095_v22, %v1094_v21  ;;  %v1097_v29 = vld [vmem:[#allocation7 + $0x1f8] sm:$0xff]  ;;  %v299_v30 = vld [vmem:[%s2653_s14 + $0xc8] sm:$0xff]  ;;  %v304_v35 = vld [vmem:[%s2653_s14 + $0xf0] sm:$0xff] }
  0x9a   : > { %475 = vmatmul.mubr.f32.gmra.mrb[6].mxu0 %v277_v60  ;;  %1867 = vmatprep.subr.bf16.mxu1 %v2435_v39  ;;  %v305_v36 = vld [vmem:[%s2653_s14 + $0xf8] sm:$0xff] }
  0x9b   : > { %732 = vmatmul.mubr.f32.gmra.mrb[6].mxu1 %v277_v60  ;;  %480 = vmatprep.mubr.f32.mxu0 %v2434_v0  ;;  %v1091_v60 = vld [vmem:[#allocation7 + $0x1c8] sm:$0xff] }
  0x9c   : > { %737 = vmatprep.mubr.f32.mxu1 %v2434_v0  ;;  %1821 = vmatpush1.bf16.msra.mxu0 %v1820_v61  ;;  %v286_v61 = vld [vmem:[%s2653_s14 + $0x60] sm:$0xff]  ;;  %v1895_v63 = vpack.c.bf16 %v1091_v60, %v1090_v59 }
  0x9d   : > { %1869 = vmatpush1.bf16.msra.mxu1 %v1868_v62  ;;  %1822 = vmatprep.subr.bf16.mxu0 %v2435_v39  ;;  %v1847_v62 = vpack.c.bf16 %v1059_v58, %v1058_v57 }
  0x9e   : > { %481 = vmatmul.mubr.f32.gmra.mrb[8].mxu0 %v278_v4  ;;  %1870 = vmatprep.subr.bf16.mxu1 %v2435_v39 }
  0x9f   : > { %738 = vmatmul.mubr.f32.gmra.mrb[8].mxu1 %v278_v4  ;;  %486 = vmatprep.mubr.f32.mxu0 %v2434_v0  ;;  %v1093_v4 = vld [vmem:[#allocation7 + $0x1d8] sm:$0xff] }
  0xa0   : > { %743 = vmatprep.mubr.f32.mxu1 %v2434_v0  ;;  %1824 = vmatpush1.bf16.msra.mxu0 %v1823_v5  ;;  %v287_v5 = vld [vmem:[%s2653_s14 + $0x68] sm:$0xff]  ;;  %v1898_v7 = vpack.c.bf16 %v1093_v4, %v1092_v3 }
  0xa1   : > { %1872 = vmatpush1.bf16.msra.mxu1 %v1871_v6  ;;  %1825 = vmatprep.subr.bf16.mxu0 %v2435_v39  ;;  %v1850_v6 = vpack.c.bf16 %v1061_v2, %v1060_v1 }
  0xa2   : > { %487 = vmatmul.mubr.f32.gmra.mrb[10].mxu0 %v279_v11  ;;  %1873 = vmatprep.subr.bf16.mxu1 %v2435_v39 }
  0xa3   : > { %744 = vmatmul.mubr.f32.gmra.mrb[10].mxu1 %v279_v11  ;;  %492 = vmatprep.mubr.f32.mxu0 %v2434_v0  ;;  %v291_v11 = vld [vmem:[%s2653_s14 + $0x88] sm:$0xff] }
  0xa4   : > { %749 = vmatprep.mubr.f32.mxu1 %v2434_v0  ;;  %1827 = vmatpush1.bf16.msra.mxu0 %v1826_v12  ;;  %v292_v12 = vld [vmem:[%s2653_s14 + $0x90] sm:$0xff] }
  0xa5   : > { %1875 = vmatpush1.bf16.msra.mxu1 %v1874_v13  ;;  %1828 = vmatprep.subr.bf16.mxu0 %v2435_v39  ;;  %v293_v13 = vld [vmem:[%s2653_s14 + $0x98] sm:$0xff] }
  0xa6   : > { %493 = vmatmul.mubr.f32.gmra.mrb[12].mxu0 %v280_v18  ;;  %1876 = vmatprep.subr.bf16.mxu1 %v2435_v39 }
  0xa7   : > { %750 = vmatmul.mubr.f32.gmra.mrb[12].mxu1 %v280_v18  ;;  %498 = vmatprep.mubr.f32.mxu0 %v2434_v0  ;;  %v1063_v18 = vld [vmem:[#allocation7 + $0xe8] sm:$0xff] }
  0xa8   : > { %755 = vmatprep.mubr.f32.mxu1 %v2434_v0  ;;  %1830 = vmatpush1.bf16.msra.mxu0 %v1829_v19  ;;  %v1853_v19 = vpack.c.bf16 %v1063_v18, %v1062_v17 }
  0xa9   : > { %1878 = vmatpush1.bf16.msra.mxu1 %v1877_v20  ;;  %1831 = vmatprep.subr.bf16.mxu0 %v2435_v39  ;;  %v297_v20 = vld [vmem:[%s2653_s14 + $0xb8] sm:$0xff] }
  0xaa   : > { %499 = vmatmul.mubr.f32.gmra.mrb[14].mxu0 %v281_v25  ;;  %1879 = vmatprep.subr.bf16.mxu1 %v2435_v39 }
  0xab   : > { %756 = vmatmul.mubr.f32.gmra.mrb[14].mxu1 %v281_v25  ;;  %504 = vmatprep.mubr.f32.mxu0 %v2434_v0  ;;  %v1064_v25 = vld [vmem:[#allocation7 + $0xf0] sm:$0xff] }
  0xac   : > { %761 = vmatprep.mubr.f32.mxu1 %v2434_v0  ;;  %1833 = vmatpush1.bf16.msra.mxu0 %v1832_v26  ;;  %v1065_v26 = vld [vmem:[#allocation7 + $0xf8] sm:$0xff] }
  0xad   : > { %1881 = vmatpush1.bf16.msra.mxu1 %v1880_v27  ;;  %1834 = vmatprep.subr.bf16.mxu0 %v2435_v39  ;;  %v1096_v27 = vld [vmem:[#allocation7 + $0x1f0] sm:$0xff]  ;;  %v1856_v28 = vpack.c.bf16 %v1065_v26, %v1064_v25 }
  0xae   : > { %505 = vmatmul.mubr.f32.gmra.mrb[16].mxu0 %v282_v32  ;;  %1882 = vmatprep.subr.bf16.mxu1 %v2435_v39  ;;  %v1904_v31 = vpack.c.bf16 %v1097_v29, %v1096_v27 }
  0xaf   : > { %762 = vmatmul.mubr.f32.gmra.mrb[16].mxu1 %v282_v32  ;;  %510 = vmatprep.mubr.f32.mxu0 %v2434_v0  ;;  %v301_v32 = vld [vmem:[%s2653_s14 + $0xd8] sm:$0xff] }
  0xb0   : > { %767 = vmatprep.mubr.f32.mxu1 %v2434_v0  ;;  %1836 = vmatpush1.bf16.msra.mxu0 %v1835_v33  ;;  %v302_v33 = vld [vmem:[%s2653_s14 + $0xe0] sm:$0xff] }
  0xb1   : > { %1884 = vmatpush1.bf16.msra.mxu1 %v1883_v34  ;;  %1837 = vmatprep.subr.bf16.mxu0 %v2435_v39  ;;  %v303_v34 = vld [vmem:[%s2653_s14 + $0xe8] sm:$0xff] }
  0xb2   : > { %511 = vmatmul.mubr.f32.gmra.mrb[18].mxu0 %v283_v40  ;;  %1885 = vmatprep.subr.bf16.mxu1 %v2435_v39 }
  0xb3   : > { %768 = vmatmul.mubr.f32.gmra.mrb[18].mxu1 %v283_v40  ;;  %516 = vmatprep.mubr.f32.mxu0 %v2434_v0  ;;  %v374_v40 = vsub.s32 0, %v373_v38 }
  0xb4   : > { %773 = vmatprep.mubr.f32.mxu1 %v2434_v0  ;;  %1839 = vmatpush1.bf16.msra.mxu0 %v1838_v41  ;;  %v370_v41 = vld [vmem:[%s3088_s2] sm:$0xf] }
  0xb5   : > { %1887 = vmatpush1.bf16.msra.mxu1 %v1886_v42  ;;  %1840 = vmatprep.subr.bf16.mxu0 %v2435_v39  ;;  %v382_v42 = vsub.s32 2, %v373_v38  ;;  %v2794_v45 = vrot.slane %v370_v41, %v374_v40 }
  0xb6   : > { %517 = vmatmul.mubr.f32.gmra.mrb[20].mxu0 %v284_v47  ;;  %1888 = vmatprep.subr.bf16.mxu1 %v2435_v39 }
  0xb7   : > { %774 = vmatmul.mubr.f32.gmra.mrb[20].mxu1 %v284_v47  ;;  %522 = vmatprep.mubr.f32.mxu0 %v2434_v0  ;;  %v2796_v46 = vrot.slane %v370_v41, %v382_v42  ;;  %v2798_v47 = vrot.slane %v370_v41, %v378_v43 }
  0xb8   : > { %779 = vmatprep.mubr.f32.mxu1 %v2434_v0  ;;  %1842 = vmatpush1.bf16.msra.mxu0 %v1841_v48  ;;  %v2800_v48 = vrot.slane %v370_v41, %v386_v44 }
  0xb9   : > { %1890 = vmatpush1.bf16.msra.mxu1 %v1889_v49  ;;  %1843 = vmatprep.subr.bf16.mxu0 %v2435_v39 }
  0xba   : > { %523 = vmatmul.mubr.f32.gmra.mrb[22].mxu0 %v285_v54  ;;  %1891 = vmatprep.subr.bf16.mxu1 %v2435_v39 }
  0xbb   : > { %780 = vmatmul.mubr.f32.gmra.mrb[22].mxu1 %v285_v54  ;;  %528 = vmatprep.mubr.f32.mxu0 %v2434_v0 }
  0xbc   : > { %785 = vmatprep.mubr.f32.mxu1 %v2434_v0  ;;  %1845 = vmatpush1.bf16.msra.mxu0 %v1844_v55 }
  0xbd   : > { %1893 = vmatpush1.bf16.msra.mxu1 %v1892_v56  ;;  %1846 = vmatprep.subr.bf16.mxu0 %v2435_v39 }
  0xbe   : > { %529 = vmatmul.mubr.f32.gmra.mrb[24].mxu0 %v286_v61  ;;  %1894 = vmatprep.subr.bf16.mxu1 %v2435_v39 }
  0xbf   : > { %786 = vmatmul.mubr.f32.gmra.mrb[24].mxu1 %v286_v61  ;;  %534 = vmatprep.mubr.f32.mxu0 %v2434_v0 }
  0xc0   : > { %791 = vmatprep.mubr.f32.mxu1 %v2434_v0  ;;  %1848 = vmatpush1.bf16.msra.mxu0 %v1847_v62 }
  0xc1   : > { %1896 = vmatpush1.bf16.msra.mxu1 %v1895_v63  ;;  %1849 = vmatprep.subr.bf16.mxu0 %v2435_v39 }
  0xc2   : > { %535 = vmatmul.mubr.f32.gmra.mrb[26].mxu0 %v287_v5  ;;  %1897 = vmatprep.subr.bf16.mxu1 %v2435_v39 }
  0xc3   : > { %792 = vmatmul.mubr.f32.gmra.mrb[26].mxu1 %v287_v5  ;;  %540 = vmatprep.mubr.f32.mxu0 %v2434_v0 }
  0xc4   : > { %797 = vmatprep.mubr.f32.mxu1 %v2434_v0  ;;  %1851 = vmatpush1.bf16.msra.mxu0 %v1850_v6 }
  0xc5   : > { %1899 = vmatpush1.bf16.msra.mxu1 %v1898_v7  ;;  %1852 = vmatprep.subr.bf16.mxu0 %v2435_v39 }
  0xc6   : > { %541 = vmatmul.mubr.f32.gmra.mrb[28].mxu0 %v288_v8  ;;  %1900 = vmatprep.subr.bf16.mxu1 %v2435_v39 }
  0xc7   : > { %798 = vmatmul.mubr.f32.gmra.mrb[28].mxu1 %v288_v8  ;;  %546 = vmatprep.mubr.f32.mxu0 %v2434_v0 }
  0xc8   : > { %803 = vmatprep.mubr.f32.mxu1 %v2434_v0  ;;  %1854 = vmatpush1.bf16.msra.mxu0 %v1853_v19 }
  0xc9   : > { %1855 = vmatprep.subr.bf16.mxu0 %v2435_v39  ;;  %1902 = vmatpush1.bf16.msra.mxu1 %v1901_v23 }
  0xca   : > { %547 = vmatmul.mubr.f32.gmra.mrb[30].mxu0 %v289_v9  ;;  %1903 = vmatprep.subr.bf16.mxu1 %v2435_v39  ;;  %v300_v39 = vld [vmem:[%s2653_s14 + $0xd0] sm:$0xff] }
  0xcb   : > { %804 = vmatmul.mubr.f32.gmra.mrb[30].mxu1 %v289_v9  ;;  %552 = vmatprep.mubr.f32.mxu0 %v2434_v0 }
  0xcc   : > { %809 = vmatprep.mubr.f32.mxu1 %v2434_v0  ;;  %1857 = vmatpush1.bf16.msra.mxu0 %v1856_v28 }
  0xcd   : > { %1905 = vmatpush1.bf16.msra.mxu1 %v1904_v31 }
  0xce   : > { %553 = vmatmul.mubr.f32.gmra.mrb[32].mxu0 %v290_v10 }
  0xcf   : > { %810 = vmatmul.mubr.f32.gmra.mrb[32].mxu1 %v290_v10  ;;  %558 = vmatprep.mubr.f32.mxu0 %v2434_v0 }
  0xd0   : > { %815 = vmatprep.mubr.f32.mxu1 %v2434_v0 }
  0xd2   : > { %559 = vmatmul.mubr.f32.gmra.mrb[34].mxu0 %v291_v11 }
  0xd3   : > { %816 = vmatmul.mubr.f32.gmra.mrb[34].mxu1 %v291_v11  ;;  %564 = vmatprep.mubr.f32.mxu0 %v2434_v0 }
  0xd4   : > { %821 = vmatprep.mubr.f32.mxu1 %v2434_v0 }
  0xd6   : > { %565 = vmatmul.mubr.f32.gmra.mrb[36].mxu0 %v292_v12 }
  0xd7   : > { %822 = vmatmul.mubr.f32.gmra.mrb[36].mxu1 %v292_v12  ;;  %570 = vmatprep.mubr.f32.mxu0 %v2434_v0 }
  0xd8   : > { %827 = vmatprep.mubr.f32.mxu1 %v2434_v0 }
  0xda   : > { %571 = vmatmul.mubr.f32.gmra.mrb[38].mxu0 %v293_v13 }
  0xdb   : > { %828 = vmatmul.mubr.f32.gmra.mrb[38].mxu1 %v293_v13  ;;  %576 = vmatprep.mubr.f32.mxu0 %v2434_v0 }
  0xdc   : > { %833 = vmatprep.mubr.f32.mxu1 %v2434_v0 }
  0xde   : > { %577 = vmatmul.mubr.f32.gmra.mrb[40].mxu0 %v294_v14 }
  0xdf   : > { %834 = vmatmul.mubr.f32.gmra.mrb[40].mxu1 %v294_v14  ;;  %582 = vmatprep.mubr.f32.mxu0 %v2434_v0 }
  0xe0   : > { %839 = vmatprep.mubr.f32.mxu1 %v2434_v0 }
  0xe2   : > { %583 = vmatmul.mubr.f32.gmra.mrb[42].mxu0 %v295_v15 }
  0xe3   : > { %840 = vmatmul.mubr.f32.gmra.mrb[42].mxu1 %v295_v15  ;;  %588 = vmatprep.mubr.f32.mxu0 %v2434_v0 }
  0xe4   : > { %845 = vmatprep.mubr.f32.mxu1 %v2434_v0 }
  0xe6   : > { %589 = vmatmul.mubr.f32.gmra.mrb[44].mxu0 %v296_v16 }
  0xe7   : > { %846 = vmatmul.mubr.f32.gmra.mrb[44].mxu1 %v296_v16  ;;  %594 = vmatprep.mubr.f32.mxu0 %v2434_v0 }
  0xe8   : > { %851 = vmatprep.mubr.f32.mxu1 %v2434_v0 }
  0xea   : > { %595 = vmatmul.mubr.f32.gmra.mrb[46].mxu0 %v297_v20 }
  0xeb   : > { %852 = vmatmul.mubr.f32.gmra.mrb[46].mxu1 %v297_v20  ;;  %600 = vmatprep.mubr.f32.mxu0 %v2434_v0 }
  0xec   : > { %857 = vmatprep.mubr.f32.mxu1 %v2434_v0 }
  0xee   : > { %601 = vmatmul.mubr.f32.gmra.mrb[48].mxu0 %v298_v24 }
  0xef   : > { %858 = vmatmul.mubr.f32.gmra.mrb[48].mxu1 %v298_v24  ;;  %606 = vmatprep.mubr.f32.mxu0 %v2434_v0 }
  0xf0   : > { %863 = vmatprep.mubr.f32.mxu1 %v2434_v0 }
  0xf2   : > { %607 = vmatmul.mubr.f32.gmra.mrb[50].mxu0 %v299_v30 }
  0xf3   : > { %864 = vmatmul.mubr.f32.gmra.mrb[50].mxu1 %v299_v30  ;;  %612 = vmatprep.mubr.f32.mxu0 %v2434_v0 }
  0xf4   : > { %869 = vmatprep.mubr.f32.mxu1 %v2434_v0 }
  0xf6   : > { %613 = vmatmul.mubr.f32.gmra.mrb[52].mxu0 %v300_v39 }
  0xf7   : > { %870 = vmatmul.mubr.f32.gmra.mrb[52].mxu1 %v300_v39  ;;  %618 = vmatprep.mubr.f32.mxu0 %v2434_v0 }
  0xf8   : > { %875 = vmatprep.mubr.f32.mxu1 %v2434_v0 }
  0xfa   : > { %619 = vmatmul.mubr.f32.gmra.mrb[54].mxu0 %v301_v32 }
  0xfb   : > { %876 = vmatmul.mubr.f32.gmra.mrb[54].mxu1 %v301_v32  ;;  %624 = vmatprep.mubr.f32.mxu0 %v2434_v0 }
  0xfc   : > { %881 = vmatprep.mubr.f32.mxu1 %v2434_v0 }
  0xfe   : > { %625 = vmatmul.mubr.f32.gmra.mrb[56].mxu0 %v302_v33 }
  0xff   : > { %882 = vmatmul.mubr.f32.gmra.mrb[56].mxu1 %v302_v33  ;;  %630 = vmatprep.mubr.f32.mxu0 %v2434_v0 }
 0x100   : > { %887 = vmatprep.mubr.f32.mxu1 %v2434_v0 }
 0x102   : > { %631 = vmatmul.mubr.f32.gmra.mrb[58].mxu0 %v303_v34 }
 0x103   : > { %888 = vmatmul.mubr.f32.gmra.mrb[58].mxu1 %v303_v34  ;;  %636 = vmatprep.mubr.f32.mxu0 %v2434_v0 }
 0x104   : > { %893 = vmatprep.mubr.f32.mxu1 %v2434_v0 }
 0x106   : > { %637 = vmatmul.mubr.f32.gmra.mrb[60].mxu0 %v304_v35 }
 0x107   : > { %894 = vmatmul.mubr.f32.gmra.mrb[60].mxu1 %v304_v35  ;;  %642 = vmatprep.mubr.f32.mxu0 %v2434_v0 }
 0x108   : > { %899 = vmatprep.mubr.f32.mxu1 %v2434_v0 }
 0x10a   : > { %643 = vmatmul.mubr.f32.gmra.mrb[62].mxu0 %v305_v36 }
 0x10b   : > { %900 = vmatmul.mubr.f32.gmra.mrb[62].mxu1 %v305_v36 }
 0x161   : > { %v458_v0 = vpop.f32.mrb[0].mxu0 }
 0x162   : > { %v459_v49 = vadd.f32 %v458_v0, %v2794_v45  ;;  %v715_v50 = vpop.f32.mrb[0].mxu1  ;;  %v460_v51 = vpop.f32.mrb[1].mxu0 }
 0x163   : > { %v716_v52 = vadd.f32 %v715_v50, %v2796_v46  ;;  %v461_v53 = vadd.f32 %v460_v51, %v2798_v47  ;;  %v717_v54 = vpop.f32.mrb[1].mxu1 }
 0x164   : > { %1981 = vtanh.f32 %v459_v49  ;;  %v718_v55 = vadd.f32 %v717_v54, %v2800_v48 }
 0x165   : > { %1983 = vtanh.f32 %v716_v52  ;;  %v464_v56 = vpop.f32.mrb[2].mxu0 }
 0x166   : > { %1985 = vtanh.f32 %v461_v53  ;;  %v465_v57 = vadd.f32 %v464_v56, %v2794_v45  ;;  %v721_v58 = vpop.f32.mrb[2].mxu1  ;;  %v466_v59 = vpop.f32.mrb[3].mxu0 }
 0x167   : > { %1987 = vtanh.f32 %v718_v55  ;;  %v722_v60 = vadd.f32 %v721_v58, %v2796_v46  ;;  %v467_v61 = vadd.f32 %v466_v59, %v2798_v47  ;;  %v723_v62 = vpop.f32.mrb[3].mxu1 }
 0x168   : > { %1989 = vtanh.f32 %v465_v57  ;;  %v724_v63 = vadd.f32 %v723_v62, %v2800_v48 }
 0x169   : > { %1991 = vtanh.f32 %v722_v60  ;;  %v470_v1 = vpop.f32.mrb[4].mxu0 }
 0x16a   : > { %1993 = vtanh.f32 %v467_v61  ;;  %v471_v2 = vadd.f32 %v470_v1, %v2794_v45  ;;  %v727_v3 = vpop.f32.mrb[4].mxu1  ;;  %v472_v4 = vpop.f32.mrb[5].mxu0 }
 0x16b   : > { %1995 = vtanh.f32 %v724_v63  ;;  %v728_v5 = vadd.f32 %v727_v3, %v2796_v46  ;;  %v473_v6 = vadd.f32 %v472_v4, %v2798_v47  ;;  %v729_v7 = vpop.f32.mrb[5].mxu1 }
 0x16c   : > { %1997 = vtanh.f32 %v471_v2  ;;  %v730_v8 = vadd.f32 %v729_v7, %v2800_v48 }
 0x16d   : > { %1999 = vtanh.f32 %v728_v5  ;;  %v476_v9 = vpop.f32.mrb[6].mxu0 }
 0x16e   : > { %v1982_v10 = vpop.eup %1981  ;;  %2001 = vtanh.f32 %v473_v6  ;;  %v477_v11 = vadd.f32 %v476_v9, %v2794_v45  ;;  %v733_v12 = vpop.f32.mrb[6].mxu1 }
 0x16f   : > { %v478_v13 = vpop.f32.mrb[7].mxu0  ;;  %v1984_v14 = vpop.eup %1983  ;;  %2003 = vtanh.f32 %v730_v8  ;;  %v734_v15 = vadd.f32 %v733_v12, %v2796_v46 }
 0x170   : > { %v479_v16 = vadd.f32 %v478_v13, %v2798_v47  ;;  %v735_v17 = vpop.f32.mrb[7].mxu1  ;;  %v1986_v18 = vpop.eup %1985  ;;  %2005 = vtanh.f32 %v477_v11 }
 0x171   : > { %v736_v19 = vadd.f32 %v735_v17, %v2800_v48  ;;  %v1988_v20 = vpop.eup %1987  ;;  %2007 = vtanh.f32 %v734_v15  ;;  %1169 = vmatprep.mubr.f32.mxu0 %v1986_v18  ;;  %v482_v21 = vpop.f32.mrb[8].mxu0 }
 0x172   : > { %v1990_v22 = vpop.eup %1989  ;;  %2009 = vtanh.f32 %v479_v16  ;;  %1394 = vmatprep.mubr.f32.mxu1 %v1988_v20  ;;  %v483_v23 = vadd.f32 %v482_v21, %v2794_v45  ;;  %v739_v24 = vpop.f32.mrb[8].mxu1  ;;  %1170 = vmatmul.mubr.f32.vlgmr.msra.gmra.mrb[64].mxu0 %v1982_v10 }
 0x173   : > { %v484_v25 = vpop.f32.mrb[9].mxu0  ;;  %v1992_v26 = vpop.eup %1991  ;;  %2011 = vtanh.f32 %v736_v19  ;;  %v740_v27 = vadd.f32 %v739_v24, %v2796_v46  ;;  %1395 = vmatmul.mubr.f32.vlgmr.msra.gmra.mrb[64].mxu1 %v1984_v14 }
 0x174   : > { %v485_v28 = vadd.f32 %v484_v25, %v2798_v47  ;;  %v741_v29 = vpop.f32.mrb[9].mxu1  ;;  %v1994_v30 = vpop.eup %1993  ;;  %2013 = vtanh.f32 %v483_v23 }
 0x175   : > { %v742_v31 = vadd.f32 %v741_v29, %v2800_v48  ;;  %v1996_v39 = vpop.eup %1995  ;;  %2015 = vtanh.f32 %v740_v27  ;;  %1174 = vmatprep.mubr.f32.mxu0 %v1994_v30  ;;  %v488_v32 = vpop.f32.mrb[10].mxu0 }
 0x176   : > { %v1998_v33 = vpop.eup %1997  ;;  %2017 = vtanh.f32 %v485_v28  ;;  %1399 = vmatprep.mubr.f32.mxu1 %v1996_v39  ;;  %v489_v34 = vadd.f32 %v488_v32, %v2794_v45  ;;  %v745_v35 = vpop.f32.mrb[10].mxu1  ;;  %1175 = vmatmul.mubr.f32.gmra.mrb[66].mxu0 %v1990_v22 }
 0x177   : > { %v490_v36 = vpop.f32.mrb[11].mxu0  ;;  %v2000_v37 = vpop.eup %1999  ;;  %2019 = vtanh.f32 %v742_v31  ;;  %v746_v38 = vadd.f32 %v745_v35, %v2796_v46  ;;  %1400 = vmatmul.mubr.f32.gmra.mrb[66].mxu1 %v1992_v26 }
 0x178   : > { %v491_v40 = vadd.f32 %v490_v36, %v2798_v47  ;;  %v747_v41 = vpop.f32.mrb[11].mxu1  ;;  %v2002_v42 = vpop.eup %2001  ;;  %2021 = vtanh.f32 %v489_v34 }
 0x179   : > { %v748_v43 = vadd.f32 %v747_v41, %v2800_v48  ;;  %v2004_v44 = vpop.eup %2003  ;;  %2023 = vtanh.f32 %v746_v38  ;;  %1179 = vmatprep.mubr.f32.mxu0 %v2002_v42  ;;  %v494_v0 = vpop.f32.mrb[12].mxu0 }
 0x17a   : > { %v2006_v49 = vpop.eup %2005  ;;  %2025 = vtanh.f32 %v491_v40  ;;  %1404 = vmatprep.mubr.f32.mxu1 %v2004_v44  ;;  %v495_v50 = vadd.f32 %v494_v0, %v2794_v45  ;;  %v751_v51 = vpop.f32.mrb[12].mxu1  ;;  %1180 = vmatmul.mubr.f32.gmra.mrb[68].mxu0 %v1998_v33 }
 0x17b   : > { %v496_v52 = vpop.f32.mrb[13].mxu0  ;;  %v2008_v53 = vpop.eup %2007  ;;  %2027 = vtanh.f32 %v748_v43  ;;  %v752_v54 = vadd.f32 %v751_v51, %v2796_v46  ;;  %1405 = vmatmul.mubr.f32.gmra.mrb[68].mxu1 %v2000_v37 }
 0x17c   : > { %v497_v55 = vadd.f32 %v496_v52, %v2798_v47  ;;  %v753_v56 = vpop.f32.mrb[13].mxu1  ;;  %v2010_v57 = vpop.eup %2009  ;;  %2029 = vtanh.f32 %v495_v50 }
 0x17d   : > { %v754_v58 = vadd.f32 %v753_v56, %v2800_v48  ;;  %v2012_v59 = vpop.eup %2011  ;;  %2031 = vtanh.f32 %v752_v54  ;;  %1184 = vmatprep.mubr.f32.mxu0 %v2010_v57  ;;  %v500_v60 = vpop.f32.mrb[14].mxu0 }
 0x17e   : > { %v2014_v61 = vpop.eup %2013  ;;  %2033 = vtanh.f32 %v497_v55  ;;  %1409 = vmatprep.mubr.f32.mxu1 %v2012_v59  ;;  %v501_v62 = vadd.f32 %v500_v60, %v2794_v45  ;;  %v757_v63 = vpop.f32.mrb[14].mxu1  ;;  %1185 = vmatmul.mubr.f32.gmra.mrb[70].mxu0 %v2006_v49 }
 0x17f   : > { %v502_v1 = vpop.f32.mrb[15].mxu0  ;;  %v2016_v2 = vpop.eup %2015  ;;  %2035 = vtanh.f32 %v754_v58  ;;  %v758_v3 = vadd.f32 %v757_v63, %v2796_v46  ;;  %1410 = vmatmul.mubr.f32.gmra.mrb[70].mxu1 %v2008_v53 }
 0x180   : > { %v503_v4 = vadd.f32 %v502_v1, %v2798_v47  ;;  %v759_v5 = vpop.f32.mrb[15].mxu1  ;;  %v2018_v6 = vpop.eup %2017  ;;  %2037 = vtanh.f32 %v501_v62 }
 0x181   : > { %v760_v7 = vadd.f32 %v759_v5, %v2800_v48  ;;  %v2020_v8 = vpop.eup %2019  ;;  %2039 = vtanh.f32 %v758_v3  ;;  %1189 = vmatprep.mubr.f32.mxu0 %v2018_v6  ;;  %v506_v9 = vpop.f32.mrb[16].mxu0 }
 0x182   : > { %v2022_v10 = vpop.eup %2021  ;;  %2041 = vtanh.f32 %v503_v4  ;;  %1414 = vmatprep.mubr.f32.mxu1 %v2020_v8  ;;  %v507_v11 = vadd.f32 %v506_v9, %v2794_v45  ;;  %v763_v12 = vpop.f32.mrb[16].mxu1  ;;  %1190 = vmatmul.mubr.f32.gmra.mrb[72].mxu0 %v2014_v61 }
 0x183   : > { %v508_v13 = vpop.f32.mrb[17].mxu0  ;;  %v2024_v14 = vpop.eup %2023  ;;  %2043 = vtanh.f32 %v760_v7  ;;  %v764_v15 = vadd.f32 %v763_v12, %v2796_v46  ;;  %1415 = vmatmul.mubr.f32.gmra.mrb[72].mxu1 %v2016_v2 }
 0x184   : > { %v509_v16 = vadd.f32 %v508_v13, %v2798_v47  ;;  %v765_v17 = vpop.f32.mrb[17].mxu1  ;;  %v2026_v18 = vpop.eup %2025  ;;  %2045 = vtanh.f32 %v507_v11 }
 0x185   : > { %v766_v19 = vadd.f32 %v765_v17, %v2800_v48  ;;  %v2028_v20 = vpop.eup %2027  ;;  %2047 = vtanh.f32 %v764_v15  ;;  %1194 = vmatprep.mubr.f32.mxu0 %v2026_v18  ;;  %v512_v21 = vpop.f32.mrb[18].mxu0 }
 0x186   : > { %v2030_v22 = vpop.eup %2029  ;;  %2049 = vtanh.f32 %v509_v16  ;;  %1419 = vmatprep.mubr.f32.mxu1 %v2028_v20  ;;  %v513_v23 = vadd.f32 %v512_v21, %v2794_v45  ;;  %v769_v24 = vpop.f32.mrb[18].mxu1  ;;  %1195 = vmatmul.mubr.f32.gmra.mrb[74].mxu0 %v2022_v10 }
 0x187   : > { %v514_v25 = vpop.f32.mrb[19].mxu0  ;;  %v2032_v26 = vpop.eup %2031  ;;  %2051 = vtanh.f32 %v766_v19  ;;  %v770_v27 = vadd.f32 %v769_v24, %v2796_v46  ;;  %1420 = vmatmul.mubr.f32.gmra.mrb[74].mxu1 %v2024_v14 }
 0x188   : > { %v515_v28 = vadd.f32 %v514_v25, %v2798_v47  ;;  %v771_v29 = vpop.f32.mrb[19].mxu1  ;;  %v2034_v30 = vpop.eup %2033  ;;  %2053 = vtanh.f32 %v513_v23 }
 0x189   : > { %v772_v31 = vadd.f32 %v771_v29, %v2800_v48  ;;  %v2036_v39 = vpop.eup %2035  ;;  %2055 = vtanh.f32 %v770_v27  ;;  %1199 = vmatprep.mubr.f32.mxu0 %v2034_v30  ;;  %v518_v32 = vpop.f32.mrb[20].mxu0 }
 0x18a   : > { %v2038_v33 = vpop.eup %2037  ;;  %2057 = vtanh.f32 %v515_v28  ;;  %1424 = vmatprep.mubr.f32.mxu1 %v2036_v39  ;;  %v519_v34 = vadd.f32 %v518_v32, %v2794_v45  ;;  %v775_v35 = vpop.f32.mrb[20].mxu1  ;;  %1200 = vmatmul.mubr.f32.gmra.mrb[76].mxu0 %v2030_v22 }
 0x18b   : > { %v520_v36 = vpop.f32.mrb[21].mxu0  ;;  %v2040_v37 = vpop.eup %2039  ;;  %2059 = vtanh.f32 %v772_v31  ;;  %v776_v38 = vadd.f32 %v775_v35, %v2796_v46  ;;  %1425 = vmatmul.mubr.f32.gmra.mrb[76].mxu1 %v2032_v26 }
 0x18c   : > { %v521_v40 = vadd.f32 %v520_v36, %v2798_v47  ;;  %v777_v41 = vpop.f32.mrb[21].mxu1  ;;  %v2042_v42 = vpop.eup %2041  ;;  %2061 = vtanh.f32 %v519_v34 }
 0x18d   : > { %v778_v43 = vadd.f32 %v777_v41, %v2800_v48  ;;  %v2044_v44 = vpop.eup %2043  ;;  %2063 = vtanh.f32 %v776_v38  ;;  %1204 = vmatprep.mubr.f32.mxu0 %v2042_v42  ;;  %v524_v0 = vpop.f32.mrb[22].mxu0 }
 0x18e   : > { %v2046_v49 = vpop.eup %2045  ;;  %2065 = vtanh.f32 %v521_v40  ;;  %1429 = vmatprep.mubr.f32.mxu1 %v2044_v44  ;;  %v525_v50 = vadd.f32 %v524_v0, %v2794_v45  ;;  %v781_v51 = vpop.f32.mrb[22].mxu1  ;;  %1205 = vmatmul.mubr.f32.gmra.mrb[78].mxu0 %v2038_v33 }
 0x18f   : > { %v526_v52 = vpop.f32.mrb[23].mxu0  ;;  %v2048_v53 = vpop.eup %2047  ;;  %2067 = vtanh.f32 %v778_v43  ;;  %v782_v54 = vadd.f32 %v781_v51, %v2796_v46  ;;  %1430 = vmatmul.mubr.f32.gmra.mrb[78].mxu1 %v2040_v37 }
 0x190   : > { %v527_v55 = vadd.f32 %v526_v52, %v2798_v47  ;;  %v783_v56 = vpop.f32.mrb[23].mxu1  ;;  %v2050_v57 = vpop.eup %2049  ;;  %2069 = vtanh.f32 %v525_v50 }
 0x191   : > { %v784_v58 = vadd.f32 %v783_v56, %v2800_v48  ;;  %v2052_v59 = vpop.eup %2051  ;;  %2071 = vtanh.f32 %v782_v54  ;;  %1209 = vmatprep.mubr.f32.mxu0 %v2050_v57  ;;  %v530_v60 = vpop.f32.mrb[24].mxu0 }
 0x192   : > { %v2054_v61 = vpop.eup %2053  ;;  %2073 = vtanh.f32 %v527_v55  ;;  %1434 = vmatprep.mubr.f32.mxu1 %v2052_v59  ;;  %v531_v62 = vadd.f32 %v530_v60, %v2794_v45  ;;  %v787_v63 = vpop.f32.mrb[24].mxu1  ;;  %1210 = vmatmul.mubr.f32.gmra.mrb[80].mxu0 %v2046_v49 }
 0x193   : > { %v532_v1 = vpop.f32.mrb[25].mxu0  ;;  %v2056_v2 = vpop.eup %2055  ;;  %2075 = vtanh.f32 %v784_v58  ;;  %v788_v3 = vadd.f32 %v787_v63, %v2796_v46  ;;  %1435 = vmatmul.mubr.f32.gmra.mrb[80].mxu1 %v2048_v53 }
 0x194   : > { %v533_v4 = vadd.f32 %v532_v1, %v2798_v47  ;;  %v789_v5 = vpop.f32.mrb[25].mxu1  ;;  %v2058_v6 = vpop.eup %2057  ;;  %2077 = vtanh.f32 %v531_v62 }
 0x195   : > { %v790_v7 = vadd.f32 %v789_v5, %v2800_v48  ;;  %v2060_v8 = vpop.eup %2059  ;;  %2079 = vtanh.f32 %v788_v3  ;;  %1214 = vmatprep.mubr.f32.mxu0 %v2058_v6  ;;  %v536_v9 = vpop.f32.mrb[26].mxu0 }
 0x196   : > { %v2062_v10 = vpop.eup %2061  ;;  %2081 = vtanh.f32 %v533_v4  ;;  %1439 = vmatprep.mubr.f32.mxu1 %v2060_v8  ;;  %v537_v11 = vadd.f32 %v536_v9, %v2794_v45  ;;  %v793_v12 = vpop.f32.mrb[26].mxu1  ;;  %1215 = vmatmul.mubr.f32.gmra.mrb[82].mxu0 %v2054_v61 }
 0x197   : > { %v538_v13 = vpop.f32.mrb[27].mxu0  ;;  %v2064_v14 = vpop.eup %2063  ;;  %2083 = vtanh.f32 %v790_v7  ;;  %v794_v15 = vadd.f32 %v793_v12, %v2796_v46  ;;  %1440 = vmatmul.mubr.f32.gmra.mrb[82].mxu1 %v2056_v2 }
 0x198   : > { %v539_v16 = vadd.f32 %v538_v13, %v2798_v47  ;;  %v795_v17 = vpop.f32.mrb[27].mxu1  ;;  %v2066_v18 = vpop.eup %2065  ;;  %2085 = vtanh.f32 %v537_v11 }
 0x199   : > { %v796_v19 = vadd.f32 %v795_v17, %v2800_v48  ;;  %v2068_v20 = vpop.eup %2067  ;;  %2087 = vtanh.f32 %v794_v15  ;;  %1219 = vmatprep.mubr.f32.mxu0 %v2066_v18  ;;  %v542_v21 = vpop.f32.mrb[28].mxu0 }
 0x19a   : > { %v2070_v22 = vpop.eup %2069  ;;  %2089 = vtanh.f32 %v539_v16  ;;  %1444 = vmatprep.mubr.f32.mxu1 %v2068_v20  ;;  %v543_v23 = vadd.f32 %v542_v21, %v2794_v45  ;;  %v799_v24 = vpop.f32.mrb[28].mxu1  ;;  %1220 = vmatmul.mubr.f32.gmra.mrb[84].mxu0 %v2062_v10 }
 0x19b   : > { %v544_v25 = vpop.f32.mrb[29].mxu0  ;;  %v2072_v26 = vpop.eup %2071  ;;  %2091 = vtanh.f32 %v796_v19  ;;  %v800_v27 = vadd.f32 %v799_v24, %v2796_v46  ;;  %1445 = vmatmul.mubr.f32.gmra.mrb[84].mxu1 %v2064_v14 }
 0x19c   : > { %v545_v28 = vadd.f32 %v544_v25, %v2798_v47  ;;  %v801_v29 = vpop.f32.mrb[29].mxu1  ;;  %v2074_v30 = vpop.eup %2073  ;;  %2093 = vtanh.f32 %v543_v23 }
 0x19d   : > { %v802_v31 = vadd.f32 %v801_v29, %v2800_v48  ;;  %v2076_v39 = vpop.eup %2075  ;;  %2095 = vtanh.f32 %v800_v27  ;;  %1224 = vmatprep.mubr.f32.mxu0 %v2074_v30  ;;  %v548_v32 = vpop.f32.mrb[30].mxu0 }
 0x19e   : > { %v2078_v33 = vpop.eup %2077  ;;  %2097 = vtanh.f32 %v545_v28  ;;  %1449 = vmatprep.mubr.f32.mxu1 %v2076_v39  ;;  %v549_v34 = vadd.f32 %v548_v32, %v2794_v45  ;;  %v805_v35 = vpop.f32.mrb[30].mxu1  ;;  %1225 = vmatmul.mubr.f32.gmra.mrb[86].mxu0 %v2070_v22 }
 0x19f   : > { %v550_v36 = vpop.f32.mrb[31].mxu0  ;;  %v2080_v37 = vpop.eup %2079  ;;  %2099 = vtanh.f32 %v802_v31  ;;  %v806_v38 = vadd.f32 %v805_v35, %v2796_v46  ;;  %1450 = vmatmul.mubr.f32.gmra.mrb[86].mxu1 %v2072_v26 }
 0x1a0   : > { %v551_v40 = vadd.f32 %v550_v36, %v2798_v47  ;;  %v807_v41 = vpop.f32.mrb[31].mxu1  ;;  %v2082_v42 = vpop.eup %2081  ;;  %2101 = vtanh.f32 %v549_v34 }
 0x1a1   : > { %v808_v43 = vadd.f32 %v807_v41, %v2800_v48  ;;  %v2084_v44 = vpop.eup %2083  ;;  %2103 = vtanh.f32 %v806_v38  ;;  %1229 = vmatprep.mubr.f32.mxu0 %v2082_v42  ;;  %v554_v0 = vpop.f32.mrb[32].mxu0 }
 0x1a2   : > { %v2086_v49 = vpop.eup %2085  ;;  %2105 = vtanh.f32 %v551_v40  ;;  %1454 = vmatprep.mubr.f32.mxu1 %v2084_v44  ;;  %v555_v50 = vadd.f32 %v554_v0, %v2794_v45  ;;  %v811_v51 = vpop.f32.mrb[32].mxu1  ;;  %1230 = vmatmul.mubr.f32.gmra.mrb[88].mxu0 %v2078_v33 }
 0x1a3   : > { %v556_v52 = vpop.f32.mrb[33].mxu0  ;;  %v2088_v53 = vpop.eup %2087  ;;  %2107 = vtanh.f32 %v808_v43  ;;  %v812_v54 = vadd.f32 %v811_v51, %v2796_v46  ;;  %1455 = vmatmul.mubr.f32.gmra.mrb[88].mxu1 %v2080_v37 }
 0x1a4   : > { %v557_v55 = vadd.f32 %v556_v52, %v2798_v47  ;;  %v813_v56 = vpop.f32.mrb[33].mxu1  ;;  %v2090_v57 = vpop.eup %2089  ;;  %2109 = vtanh.f32 %v555_v50 }
 0x1a5   : > { %v814_v58 = vadd.f32 %v813_v56, %v2800_v48  ;;  %v2092_v59 = vpop.eup %2091  ;;  %2111 = vtanh.f32 %v812_v54  ;;  %1234 = vmatprep.mubr.f32.mxu0 %v2090_v57  ;;  %v560_v60 = vpop.f32.mrb[34].mxu0 }
 0x1a6   : > { %v2094_v61 = vpop.eup %2093  ;;  %2113 = vtanh.f32 %v557_v55  ;;  %1459 = vmatprep.mubr.f32.mxu1 %v2092_v59  ;;  %v561_v62 = vadd.f32 %v560_v60, %v2794_v45  ;;  %v817_v63 = vpop.f32.mrb[34].mxu1  ;;  %1235 = vmatmul.mubr.f32.gmra.mrb[90].mxu0 %v2086_v49 }
 0x1a7   : > { %v562_v1 = vpop.f32.mrb[35].mxu0  ;;  %v2096_v2 = vpop.eup %2095  ;;  %2115 = vtanh.f32 %v814_v58  ;;  %v818_v3 = vadd.f32 %v817_v63, %v2796_v46  ;;  %1460 = vmatmul.mubr.f32.gmra.mrb[90].mxu1 %v2088_v53 }
 0x1a8   : > { %v563_v4 = vadd.f32 %v562_v1, %v2798_v47  ;;  %v819_v5 = vpop.f32.mrb[35].mxu1  ;;  %v2098_v6 = vpop.eup %2097  ;;  %2117 = vtanh.f32 %v561_v62 }
 0x1a9   : > { %v820_v7 = vadd.f32 %v819_v5, %v2800_v48  ;;  %v2100_v8 = vpop.eup %2099  ;;  %2119 = vtanh.f32 %v818_v3  ;;  %1239 = vmatprep.mubr.f32.mxu0 %v2098_v6  ;;  %v566_v9 = vpop.f32.mrb[36].mxu0 }
 0x1aa   : > { %v2102_v10 = vpop.eup %2101  ;;  %2121 = vtanh.f32 %v563_v4  ;;  %1464 = vmatprep.mubr.f32.mxu1 %v2100_v8  ;;  %v567_v11 = vadd.f32 %v566_v9, %v2794_v45  ;;  %v823_v12 = vpop.f32.mrb[36].mxu1  ;;  %1240 = vmatmul.mubr.f32.gmra.mrb[92].mxu0 %v2094_v61 }
 0x1ab   : > { %v568_v13 = vpop.f32.mrb[37].mxu0  ;;  %v2104_v14 = vpop.eup %2103  ;;  %2123 = vtanh.f32 %v820_v7  ;;  %v824_v15 = vadd.f32 %v823_v12, %v2796_v46  ;;  %1465 = vmatmul.mubr.f32.gmra.mrb[92].mxu1 %v2096_v2 }
 0x1ac   : > { %v569_v16 = vadd.f32 %v568_v13, %v2798_v47  ;;  %v825_v17 = vpop.f32.mrb[37].mxu1  ;;  %v2106_v18 = vpop.eup %2105  ;;  %2125 = vtanh.f32 %v567_v11 }
 0x1ad   : > { %v826_v19 = vadd.f32 %v825_v17, %v2800_v48  ;;  %v2108_v20 = vpop.eup %2107  ;;  %2127 = vtanh.f32 %v824_v15  ;;  %1244 = vmatprep.mubr.f32.mxu0 %v2106_v18  ;;  %v572_v21 = vpop.f32.mrb[38].mxu0 }
 0x1ae   : > { %v2110_v22 = vpop.eup %2109  ;;  %2129 = vtanh.f32 %v569_v16  ;;  %1469 = vmatprep.mubr.f32.mxu1 %v2108_v20  ;;  %v573_v23 = vadd.f32 %v572_v21, %v2794_v45  ;;  %v829_v24 = vpop.f32.mrb[38].mxu1  ;;  %1245 = vmatmul.mubr.f32.gmra.mrb[94].mxu0 %v2102_v10 }
 0x1af   : > { %v574_v25 = vpop.f32.mrb[39].mxu0  ;;  %v2112_v26 = vpop.eup %2111  ;;  %2131 = vtanh.f32 %v826_v19  ;;  %v830_v27 = vadd.f32 %v829_v24, %v2796_v46  ;;  %1470 = vmatmul.mubr.f32.gmra.mrb[94].mxu1 %v2104_v14 }
 0x1b0   : > { %v575_v28 = vadd.f32 %v574_v25, %v2798_v47  ;;  %v831_v29 = vpop.f32.mrb[39].mxu1  ;;  %v2114_v30 = vpop.eup %2113  ;;  %2133 = vtanh.f32 %v573_v23 }
 0x1b1   : > { %v832_v31 = vadd.f32 %v831_v29, %v2800_v48  ;;  %v2116_v39 = vpop.eup %2115  ;;  %2135 = vtanh.f32 %v830_v27  ;;  %1249 = vmatprep.mubr.f32.mxu0 %v2114_v30  ;;  %v578_v32 = vpop.f32.mrb[40].mxu0 }
 0x1b2   : > { %v2118_v33 = vpop.eup %2117  ;;  %2137 = vtanh.f32 %v575_v28  ;;  %1474 = vmatprep.mubr.f32.mxu1 %v2116_v39  ;;  %v579_v34 = vadd.f32 %v578_v32, %v2794_v45  ;;  %v835_v35 = vpop.f32.mrb[40].mxu1  ;;  %1250 = vmatmul.mubr.f32.gmra.mrb[96].mxu0 %v2110_v22 }
 0x1b3   : > { %v580_v36 = vpop.f32.mrb[41].mxu0  ;;  %v2120_v37 = vpop.eup %2119  ;;  %2139 = vtanh.f32 %v832_v31  ;;  %v836_v38 = vadd.f32 %v835_v35, %v2796_v46  ;;  %1475 = vmatmul.mubr.f32.gmra.mrb[96].mxu1 %v2112_v26 }
 0x1b4   : > { %v581_v40 = vadd.f32 %v580_v36, %v2798_v47  ;;  %v837_v41 = vpop.f32.mrb[41].mxu1  ;;  %v2122_v42 = vpop.eup %2121  ;;  %2141 = vtanh.f32 %v579_v34 }
 0x1b5   : > { %v838_v43 = vadd.f32 %v837_v41, %v2800_v48  ;;  %v2124_v44 = vpop.eup %2123  ;;  %2143 = vtanh.f32 %v836_v38  ;;  %1254 = vmatprep.mubr.f32.mxu0 %v2122_v42  ;;  %v584_v0 = vpop.f32.mrb[42].mxu0 }
 0x1b6   : > { %v2126_v49 = vpop.eup %2125  ;;  %2145 = vtanh.f32 %v581_v40  ;;  %1479 = vmatprep.mubr.f32.mxu1 %v2124_v44  ;;  %v585_v50 = vadd.f32 %v584_v0, %v2794_v45  ;;  %v841_v51 = vpop.f32.mrb[42].mxu1  ;;  %1255 = vmatmul.mubr.f32.gmra.mrb[98].mxu0 %v2118_v33 }
 0x1b7   : > { %v586_v52 = vpop.f32.mrb[43].mxu0  ;;  %v2128_v53 = vpop.eup %2127  ;;  %2147 = vtanh.f32 %v838_v43  ;;  %v842_v54 = vadd.f32 %v841_v51, %v2796_v46  ;;  %1480 = vmatmul.mubr.f32.gmra.mrb[98].mxu1 %v2120_v37 }
 0x1b8   : > { %v587_v55 = vadd.f32 %v586_v52, %v2798_v47  ;;  %v843_v56 = vpop.f32.mrb[43].mxu1  ;;  %v2130_v57 = vpop.eup %2129  ;;  %2149 = vtanh.f32 %v585_v50 }
 0x1b9   : > { %v844_v58 = vadd.f32 %v843_v56, %v2800_v48  ;;  %v2132_v59 = vpop.eup %2131  ;;  %2151 = vtanh.f32 %v842_v54  ;;  %1259 = vmatprep.mubr.f32.mxu0 %v2130_v57  ;;  %v590_v60 = vpop.f32.mrb[44].mxu0 }
 0x1ba   : > { %v2134_v61 = vpop.eup %2133  ;;  %2153 = vtanh.f32 %v587_v55  ;;  %1484 = vmatprep.mubr.f32.mxu1 %v2132_v59  ;;  %v591_v62 = vadd.f32 %v590_v60, %v2794_v45  ;;  %v847_v63 = vpop.f32.mrb[44].mxu1  ;;  %1260 = vmatmul.mubr.f32.gmra.mrb[100].mxu0 %v2126_v49 }
 0x1bb   : > { %v592_v1 = vpop.f32.mrb[45].mxu0  ;;  %v2136_v2 = vpop.eup %2135  ;;  %2155 = vtanh.f32 %v844_v58  ;;  %v848_v3 = vadd.f32 %v847_v63, %v2796_v46  ;;  %1485 = vmatmul.mubr.f32.gmra.mrb[100].mxu1 %v2128_v53 }
 0x1bc   : > { %v593_v4 = vadd.f32 %v592_v1, %v2798_v47  ;;  %v849_v5 = vpop.f32.mrb[45].mxu1  ;;  %v2138_v6 = vpop.eup %2137  ;;  %2157 = vtanh.f32 %v591_v62 }
 0x1bd   : > { %v850_v7 = vadd.f32 %v849_v5, %v2800_v48  ;;  %v2140_v8 = vpop.eup %2139  ;;  %2159 = vtanh.f32 %v848_v3  ;;  %1264 = vmatprep.mubr.f32.mxu0 %v2138_v6  ;;  %v596_v9 = vpop.f32.mrb[46].mxu0 }
 0x1be   : > { %v2142_v10 = vpop.eup %2141  ;;  %2161 = vtanh.f32 %v593_v4  ;;  %1489 = vmatprep.mubr.f32.mxu1 %v2140_v8  ;;  %v597_v11 = vadd.f32 %v596_v9, %v2794_v45  ;;  %v853_v12 = vpop.f32.mrb[46].mxu1  ;;  %1265 = vmatmul.mubr.f32.gmra.mrb[102].mxu0 %v2134_v61 }
 0x1bf   : > { %v598_v13 = vpop.f32.mrb[47].mxu0  ;;  %v2144_v14 = vpop.eup %2143  ;;  %2163 = vtanh.f32 %v850_v7  ;;  %v854_v15 = vadd.f32 %v853_v12, %v2796_v46  ;;  %1490 = vmatmul.mubr.f32.gmra.mrb[102].mxu1 %v2136_v2 }
 0x1c0   : > { %v599_v16 = vadd.f32 %v598_v13, %v2798_v47  ;;  %v855_v17 = vpop.f32.mrb[47].mxu1  ;;  %v2146_v18 = vpop.eup %2145  ;;  %2165 = vtanh.f32 %v597_v11 }
 0x1c1   : > { %v856_v19 = vadd.f32 %v855_v17, %v2800_v48  ;;  %v2148_v20 = vpop.eup %2147  ;;  %2167 = vtanh.f32 %v854_v15  ;;  %1269 = vmatprep.mubr.f32.mxu0 %v2146_v18  ;;  %v602_v21 = vpop.f32.mrb[48].mxu0 }
 0x1c2   : > { %v2150_v22 = vpop.eup %2149  ;;  %2169 = vtanh.f32 %v599_v16  ;;  %1494 = vmatprep.mubr.f32.mxu1 %v2148_v20  ;;  %v603_v23 = vadd.f32 %v602_v21, %v2794_v45  ;;  %v859_v24 = vpop.f32.mrb[48].mxu1  ;;  %1270 = vmatmul.mubr.f32.gmra.mrb[104].mxu0 %v2142_v10 }
 0x1c3   : > { %v604_v25 = vpop.f32.mrb[49].mxu0  ;;  %v2152_v26 = vpop.eup %2151  ;;  %2171 = vtanh.f32 %v856_v19  ;;  %v860_v27 = vadd.f32 %v859_v24, %v2796_v46  ;;  %1495 = vmatmul.mubr.f32.gmra.mrb[104].mxu1 %v2144_v14 }
 0x1c4   : > { %v605_v28 = vadd.f32 %v604_v25, %v2798_v47  ;;  %v861_v29 = vpop.f32.mrb[49].mxu1  ;;  %v2154_v30 = vpop.eup %2153  ;;  %2173 = vtanh.f32 %v603_v23 }
 0x1c5   : > { %v862_v31 = vadd.f32 %v861_v29, %v2800_v48  ;;  %v2156_v39 = vpop.eup %2155  ;;  %2175 = vtanh.f32 %v860_v27  ;;  %1274 = vmatprep.mubr.f32.mxu0 %v2154_v30  ;;  %v608_v32 = vpop.f32.mrb[50].mxu0 }
 0x1c6   : > { %v2158_v33 = vpop.eup %2157  ;;  %2177 = vtanh.f32 %v605_v28  ;;  %1499 = vmatprep.mubr.f32.mxu1 %v2156_v39  ;;  %v609_v34 = vadd.f32 %v608_v32, %v2794_v45  ;;  %v865_v35 = vpop.f32.mrb[50].mxu1  ;;  %1275 = vmatmul.mubr.f32.gmra.mrb[106].mxu0 %v2150_v22 }
 0x1c7   : > { %v610_v36 = vpop.f32.mrb[51].mxu0  ;;  %v2160_v37 = vpop.eup %2159  ;;  %2179 = vtanh.f32 %v862_v31  ;;  %v866_v38 = vadd.f32 %v865_v35, %v2796_v46  ;;  %1500 = vmatmul.mubr.f32.gmra.mrb[106].mxu1 %v2152_v26 }
 0x1c8   : > { %v611_v40 = vadd.f32 %v610_v36, %v2798_v47  ;;  %v867_v41 = vpop.f32.mrb[51].mxu1  ;;  %v2162_v42 = vpop.eup %2161  ;;  %2181 = vtanh.f32 %v609_v34 }
 0x1c9   : > { %v868_v43 = vadd.f32 %v867_v41, %v2800_v48  ;;  %v2164_v44 = vpop.eup %2163  ;;  %2183 = vtanh.f32 %v866_v38  ;;  %1279 = vmatprep.mubr.f32.mxu0 %v2162_v42  ;;  %v614_v0 = vpop.f32.mrb[52].mxu0 }
 0x1ca   : > { %v2166_v49 = vpop.eup %2165  ;;  %2185 = vtanh.f32 %v611_v40  ;;  %1504 = vmatprep.mubr.f32.mxu1 %v2164_v44  ;;  %v615_v50 = vadd.f32 %v614_v0, %v2794_v45  ;;  %v871_v51 = vpop.f32.mrb[52].mxu1  ;;  %1280 = vmatmul.mubr.f32.gmra.mrb[108].mxu0 %v2158_v33 }
 0x1cb   : > { %v616_v52 = vpop.f32.mrb[53].mxu0  ;;  %v2168_v53 = vpop.eup %2167  ;;  %2187 = vtanh.f32 %v868_v43  ;;  %v872_v54 = vadd.f32 %v871_v51, %v2796_v46  ;;  %1505 = vmatmul.mubr.f32.gmra.mrb[108].mxu1 %v2160_v37 }
 0x1cc   : > { %v617_v55 = vadd.f32 %v616_v52, %v2798_v47  ;;  %v873_v56 = vpop.f32.mrb[53].mxu1  ;;  %v2170_v57 = vpop.eup %2169  ;;  %2189 = vtanh.f32 %v615_v50 }
 0x1cd   : > { %v874_v58 = vadd.f32 %v873_v56, %v2800_v48  ;;  %v2172_v59 = vpop.eup %2171  ;;  %2191 = vtanh.f32 %v872_v54  ;;  %1284 = vmatprep.mubr.f32.mxu0 %v2170_v57  ;;  %v620_v60 = vpop.f32.mrb[54].mxu0 }
 0x1ce   : > { %v2174_v61 = vpop.eup %2173  ;;  %2193 = vtanh.f32 %v617_v55  ;;  %1509 = vmatprep.mubr.f32.mxu1 %v2172_v59  ;;  %v621_v62 = vadd.f32 %v620_v60, %v2794_v45  ;;  %v877_v63 = vpop.f32.mrb[54].mxu1  ;;  %1285 = vmatmul.mubr.f32.gmra.mrb[110].mxu0 %v2166_v49 }
 0x1cf   : > { %v622_v1 = vpop.f32.mrb[55].mxu0  ;;  %v2176_v2 = vpop.eup %2175  ;;  %2195 = vtanh.f32 %v874_v58  ;;  %v878_v3 = vadd.f32 %v877_v63, %v2796_v46  ;;  %1510 = vmatmul.mubr.f32.gmra.mrb[110].mxu1 %v2168_v53 }
 0x1d0   : > { %v623_v4 = vadd.f32 %v622_v1, %v2798_v47  ;;  %v879_v5 = vpop.f32.mrb[55].mxu1  ;;  %v2178_v6 = vpop.eup %2177  ;;  %2197 = vtanh.f32 %v621_v62 }
 0x1d1   : > { %v880_v7 = vadd.f32 %v879_v5, %v2800_v48  ;;  %v2180_v8 = vpop.eup %2179  ;;  %2199 = vtanh.f32 %v878_v3  ;;  %1289 = vmatprep.mubr.f32.mxu0 %v2178_v6  ;;  %v626_v9 = vpop.f32.mrb[56].mxu0  ;;  %v2933_v5 = vld [vmem:[%s3090_s4] ss:$0 sm:$0xff] }
 0x1d2   : > { %v2182_v10 = vpop.eup %2181  ;;  %2201 = vtanh.f32 %v623_v4  ;;  %1514 = vmatprep.mubr.f32.mxu1 %v2180_v8  ;;  %v627_v11 = vadd.f32 %v626_v9, %v2794_v45  ;;  %v883_v12 = vpop.f32.mrb[56].mxu1  ;;  %1290 = vmatmul.mubr.f32.gmra.mrb[112].mxu0 %v2174_v61 }
 0x1d3   : > { %v628_v13 = vpop.f32.mrb[57].mxu0  ;;  %v2184_v14 = vpop.eup %2183  ;;  %2203 = vtanh.f32 %v880_v7  ;;  %v884_v15 = vadd.f32 %v883_v12, %v2796_v46  ;;  %1515 = vmatmul.mubr.f32.gmra.mrb[112].mxu1 %v2176_v2 }
 0x1d4   : > { %v629_v16 = vadd.f32 %v628_v13, %v2798_v47  ;;  %v885_v17 = vpop.f32.mrb[57].mxu1  ;;  %v2186_v18 = vpop.eup %2185  ;;  %2205 = vtanh.f32 %v627_v11  ;;  %v2237_v13 = vld [vmem:[%s2653_s14] sm:$0xff] }
 0x1d5   : > { %v886_v19 = vadd.f32 %v885_v17, %v2800_v48  ;;  %v2188_v20 = vpop.eup %2187  ;;  %2207 = vtanh.f32 %v884_v15  ;;  %1294 = vmatprep.mubr.f32.mxu0 %v2186_v18  ;;  %v632_v21 = vpop.f32.mrb[58].mxu0 }
 0x1d6   : > { %v2190_v22 = vpop.eup %2189  ;;  %2209 = vtanh.f32 %v629_v16  ;;  %1519 = vmatprep.mubr.f32.mxu1 %v2188_v20  ;;  %v633_v23 = vadd.f32 %v632_v21, %v2794_v45  ;;  %v889_v24 = vpop.f32.mrb[58].mxu1  ;;  %1295 = vmatmul.mubr.f32.gmra.mrb[114].mxu0 %v2182_v10  ;;  %v2238_v21 = vld [vmem:[%s2653_s14 + $0x8] sm:$0xff] }
 0x1d7   : > { %v634_v25 = vpop.f32.mrb[59].mxu0  ;;  %v2192_v26 = vpop.eup %2191  ;;  %2211 = vtanh.f32 %v886_v19  ;;  %v890_v27 = vadd.f32 %v889_v24, %v2796_v46  ;;  %1520 = vmatmul.mubr.f32.gmra.mrb[114].mxu1 %v2184_v14 }
 0x1d8   : > { %v635_v28 = vadd.f32 %v634_v25, %v2798_v47  ;;  %v891_v29 = vpop.f32.mrb[59].mxu1  ;;  %v2194_v30 = vpop.eup %2193  ;;  %2213 = vtanh.f32 %v633_v23 }
 0x1d9   : > { %v892_v31 = vadd.f32 %v891_v29, %v2800_v48  ;;  %v2196_v39 = vpop.eup %2195  ;;  %2215 = vtanh.f32 %v890_v27  ;;  %1299 = vmatprep.mubr.f32.mxu0 %v2194_v30  ;;  %v638_v32 = vpop.f32.mrb[60].mxu0  ;;  %v2239_v29 = vld [vmem:[%s2653_s14 + $0x10] sm:$0xff] }
 0x1da   : > { %v2198_v33 = vpop.eup %2197  ;;  %2217 = vtanh.f32 %v635_v28  ;;  %1524 = vmatprep.mubr.f32.mxu1 %v2196_v39  ;;  %v639_v34 = vadd.f32 %v638_v32, %v2794_v45  ;;  %v895_v35 = vpop.f32.mrb[60].mxu1  ;;  %1300 = vmatmul.mubr.f32.gmra.mrb[116].mxu0 %v2190_v22 }
 0x1db   : > { %v640_v36 = vpop.f32.mrb[61].mxu0  ;;  %v2200_v37 = vpop.eup %2199  ;;  %2219 = vtanh.f32 %v892_v31  ;;  %v896_v38 = vadd.f32 %v895_v35, %v2796_v46  ;;  %1525 = vmatmul.mubr.f32.gmra.mrb[116].mxu1 %v2192_v26 }
 0x1dc   : > { %v641_v40 = vadd.f32 %v640_v36, %v2798_v47  ;;  %v897_v41 = vpop.f32.mrb[61].mxu1  ;;  %v2202_v42 = vpop.eup %2201  ;;  %2221 = vtanh.f32 %v639_v34  ;;  %v2240_v36 = vld [vmem:[%s2653_s14 + $0x18] sm:$0xff] }
 0x1dd   : > { %v898_v43 = vadd.f32 %v897_v41, %v2800_v48  ;;  %v2204_v44 = vpop.eup %2203  ;;  %2223 = vtanh.f32 %v896_v38  ;;  %1304 = vmatprep.mubr.f32.mxu0 %v2202_v42  ;;  %v644_v0 = vpop.f32.mrb[62].mxu0 }
 0x1de   : > { %v2206_v49 = vpop.eup %2205  ;;  %2225 = vtanh.f32 %v641_v40  ;;  %1529 = vmatprep.mubr.f32.mxu1 %v2204_v44  ;;  %v645_v50 = vadd.f32 %v644_v0, %v2794_v45  ;;  %v901_v51 = vpop.f32.mrb[62].mxu1  ;;  %1305 = vmatmul.mubr.f32.gmra.mrb[118].mxu0 %v2198_v33  ;;  %v2241_v0 = vld [vmem:[%s2653_s14 + $0x20] sm:$0xff] }
 0x1df   : > { %v646_v52 = vpop.f32.mrb[63].mxu0  ;;  %v2208_v53 = vpop.eup %2207  ;;  %2227 = vtanh.f32 %v898_v43  ;;  %v902_v54 = vadd.f32 %v901_v51, %v2796_v46  ;;  %1530 = vmatmul.mubr.f32.gmra.mrb[118].mxu1 %v2200_v37 }
 0x1e0   : > { %v647_v55 = vadd.f32 %v646_v52, %v2798_v47  ;;  %v903_v56 = vpop.f32.mrb[63].mxu1  ;;  %v2210_v57 = vpop.eup %2209  ;;  %2229 = vtanh.f32 %v645_v50 }
 0x1e1   : > { %v904_v58 = vadd.f32 %v903_v56, %v2800_v48  ;;  %v2212_v59 = vpop.eup %2211  ;;  %2231 = vtanh.f32 %v902_v54  ;;  %1309 = vmatprep.mubr.f32.mxu0 %v2210_v57  ;;  %v2242_v56 = vld [vmem:[%s2653_s14 + $0x28] sm:$0xff] }
 0x1e2   : > { %v2214_v60 = vpop.eup %2213  ;;  %2233 = vtanh.f32 %v647_v55  ;;  %1534 = vmatprep.mubr.f32.mxu1 %v2212_v59  ;;  %1310 = vmatmul.mubr.f32.gmra.mrb[120].mxu0 %v2206_v49 }
 0x1e3   : > { %v2216_v45 = vpop.eup %2215  ;;  %2235 = vtanh.f32 %v904_v58  ;;  %1535 = vmatmul.mubr.f32.gmra.mrb[120].mxu1 %v2208_v53 }
 0x1e4   : > { %v2218_v61 = vpop.eup %2217 }
 0x1e5   : > { %v2220_v46 = vpop.eup %2219  ;;  %1314 = vmatprep.mubr.f32.mxu0 %v2218_v61 }
 0x1e6   : > { %v2222_v62 = vpop.eup %2221  ;;  %1539 = vmatprep.mubr.f32.mxu1 %v2220_v46  ;;  %1315 = vmatmul.mubr.f32.gmra.mrb[122].mxu0 %v2214_v60 }
 0x1e7   : > { %v2224_v47 = vpop.eup %2223  ;;  %1540 = vmatmul.mubr.f32.gmra.mrb[122].mxu1 %v2216_v45 }
 0x1e8   : > { %v2226_v63 = vpop.eup %2225 }
 0x1e9   : > { %v2228_v48 = vpop.eup %2227  ;;  %1319 = vmatprep.mubr.f32.mxu0 %v2226_v63 }
 0x1ea   : > { %v2230_v1 = vpop.eup %2229  ;;  %1544 = vmatprep.mubr.f32.mxu1 %v2228_v48  ;;  %1320 = vmatmul.mubr.f32.gmra.mrb[124].mxu0 %v2222_v62  ;;  %v2243_v62 = vld [vmem:[%s2653_s14 + $0x30] sm:$0xff] }
 0x1eb   : > { %v2232_v2 = vpop.eup %2231  ;;  %1545 = vmatmul.mubr.f32.gmra.mrb[124].mxu1 %v2224_v47 }
 0x1ec   : > { %v2234_v3 = vpop.eup %2233 }
 0x1ed   : > { %v2236_v4 = vpop.eup %2235  ;;  %1324 = vmatprep.mubr.f32.mxu0 %v2234_v3 }
 0x1ee   : > { %1549 = vmatprep.mubr.f32.mxu1 %v2236_v4  ;;  %1325 = vmatmul.mubr.f32.gmra.mrb[126].mxu0 %v2230_v1 }
 0x1ef   : > { %1550 = vmatmul.mubr.f32.gmra.mrb[126].mxu1 %v2232_v2 }
 0x245   : > { %v1171_v6 = vpop.f32.mrb[64].mxu0 }
 0x246   : > { %v1172_v7 = vadd.f32 %v2933_v5, %v1171_v6  ;;  %v1396_v8 = vpop.f32.mrb[64].mxu1  ;;  %v1173_v9 = vpop.f32.mrb[65].mxu0  ;;  %v2244_v6 = vld [vmem:[%s2653_s14 + $0x38] sm:$0xff] }
 0x247   : > { %v1398_v10 = vpop.f32.mrb[65].mxu1 }
 0x248   : > { %v1397_v11 = vadd.f32 %v1396_v8, %v1172_v7 }
 0x249   : > { %v1176_v12 = vpop.f32.mrb[66].mxu0 }
 0x24a   : > { %v1555_v14 = vadd.f32 %v2237_v13, %v1397_v11  ;;  %v1177_v15 = vadd.f32 %v2933_v5, %v1176_v12  ;;  %v1401_v16 = vpop.f32.mrb[66].mxu1  ;;  %v1178_v17 = vpop.f32.mrb[67].mxu0 }
 0x24b   : > { %v1403_v18 = vpop.f32.mrb[67].mxu1 }
 0x24c   : > { %1587 = vst [vmem:[%s2940_s10] sm:$0xff] %v1555_v14  ;;  %v1402_v19 = vadd.f32 %v1401_v16, %v1177_v15  ;;  %v2245_v14 = vld [vmem:[%s2653_s14 + $0x40] sm:$0xff] }
 0x24d   : > { %v1181_v20 = vpop.f32.mrb[68].mxu0 }
 0x24e   : > { %v1556_v22 = vadd.f32 %v2238_v21, %v1402_v19  ;;  %v1182_v23 = vadd.f32 %v2933_v5, %v1181_v20  ;;  %v1406_v24 = vpop.f32.mrb[68].mxu1  ;;  %v1183_v25 = vpop.f32.mrb[69].mxu0 }
 0x24f   : > { %v1408_v26 = vpop.f32.mrb[69].mxu1 }
 0x250   : > { %1588 = vst [vmem:[%s2940_s10 + $0x8] sm:$0xff] %v1556_v22  ;;  %v1407_v27 = vadd.f32 %v1406_v24, %v1182_v23  ;;  %v2246_v22 = vld [vmem:[%s2653_s14 + $0x48] sm:$0xff] }
 0x251   : > { %v1186_v28 = vpop.f32.mrb[70].mxu0 }
 0x252   : > { %v1557_v30 = vadd.f32 %v2239_v29, %v1407_v27  ;;  %v1187_v31 = vadd.f32 %v2933_v5, %v1186_v28  ;;  %v1411_v39 = vpop.f32.mrb[70].mxu1  ;;  %v1188_v32 = vpop.f32.mrb[71].mxu0 }
 0x253   : > { %v1413_v33 = vpop.f32.mrb[71].mxu1 }
 0x254   : > { %1589 = vst [vmem:[%s2940_s10 + $0x10] sm:$0xff] %v1557_v30  ;;  %v1412_v34 = vadd.f32 %v1411_v39, %v1187_v31  ;;  %v2247_v30 = vld [vmem:[%s2653_s14 + $0x50] sm:$0xff] }
 0x255   : > { %v1191_v35 = vpop.f32.mrb[72].mxu0 }
 0x256   : > { %v1558_v37 = vadd.f32 %v2240_v36, %v1412_v34  ;;  %v1192_v38 = vadd.f32 %v2933_v5, %v1191_v35  ;;  %v1416_v40 = vpop.f32.mrb[72].mxu1  ;;  %v1193_v41 = vpop.f32.mrb[73].mxu0 }
 0x257   : > { %v1418_v42 = vpop.f32.mrb[73].mxu1 }
 0x258   : > { %1590 = vst [vmem:[%s2940_s10 + $0x18] sm:$0xff] %v1558_v37  ;;  %v1417_v43 = vadd.f32 %v1416_v40, %v1192_v38  ;;  %v2248_v37 = vld [vmem:[%s2653_s14 + $0x58] sm:$0xff] }
 0x259   : > { %v1196_v44 = vpop.f32.mrb[74].mxu0 }
 0x25a   : > { %v1559_v49 = vadd.f32 %v2241_v0, %v1417_v43  ;;  %v1197_v50 = vadd.f32 %v2933_v5, %v1196_v44  ;;  %v1421_v51 = vpop.f32.mrb[74].mxu1  ;;  %v1198_v52 = vpop.f32.mrb[75].mxu0 }
 0x25b   : > { %v1423_v53 = vpop.f32.mrb[75].mxu1 }
 0x25c   : > { %1591 = vst [vmem:[%s2940_s10 + $0x20] sm:$0xff] %v1559_v49  ;;  %v1422_v54 = vadd.f32 %v1421_v51, %v1197_v50  ;;  %v2249_v49 = vld [vmem:[%s2653_s14 + $0x60] sm:$0xff] }
 0x25d   : > { %v1201_v55 = vpop.f32.mrb[76].mxu0 }
 0x25e   : > { %v1560_v57 = vadd.f32 %v2242_v56, %v1422_v54  ;;  %v1202_v58 = vadd.f32 %v2933_v5, %v1201_v55  ;;  %v1426_v59 = vpop.f32.mrb[76].mxu1  ;;  %v1203_v60 = vpop.f32.mrb[77].mxu0 }
 0x25f   : > { %v1428_v45 = vpop.f32.mrb[77].mxu1 }
 0x260   : > { %1592 = vst [vmem:[%s2940_s10 + $0x28] sm:$0xff] %v1560_v57  ;;  %v1427_v61 = vadd.f32 %v1426_v59, %v1202_v58  ;;  %v2250_v57 = vld [vmem:[%s2653_s14 + $0x68] sm:$0xff] }
 0x261   : > { %v1206_v46 = vpop.f32.mrb[78].mxu0 }
 0x262   : > { %v1561_v47 = vadd.f32 %v2243_v62, %v1427_v61  ;;  %v1207_v63 = vadd.f32 %v2933_v5, %v1206_v46  ;;  %v1431_v48 = vpop.f32.mrb[78].mxu1  ;;  %v1208_v1 = vpop.f32.mrb[79].mxu0 }
 0x263   : > { %v1433_v2 = vpop.f32.mrb[79].mxu1 }
 0x264   : > { %1593 = vst [vmem:[%s2940_s10 + $0x30] sm:$0xff] %v1561_v47  ;;  %v1432_v3 = vadd.f32 %v1431_v48, %v1207_v63  ;;  %v2251_v47 = vld [vmem:[%s2653_s14 + $0x70] sm:$0xff] }
 0x265   : > { %v1211_v4 = vpop.f32.mrb[80].mxu0 }
 0x266   : > { %v1562_v7 = vadd.f32 %v2244_v6, %v1432_v3  ;;  %v1212_v8 = vadd.f32 %v2933_v5, %v1211_v4  ;;  %v1436_v9 = vpop.f32.mrb[80].mxu1  ;;  %v1213_v10 = vpop.f32.mrb[81].mxu0 }
 0x267   : > { %v1438_v11 = vpop.f32.mrb[81].mxu1 }
 0x268   : > { %1594 = vst [vmem:[%s2940_s10 + $0x38] sm:$0xff] %v1562_v7  ;;  %v1437_v12 = vadd.f32 %v1436_v9, %v1212_v8  ;;  %v2252_v7 = vld [vmem:[%s2653_s14 + $0x78] sm:$0xff] }
 0x269   : > { %v1216_v13 = vpop.f32.mrb[82].mxu0 }
 0x26a   : > { %v1563_v15 = vadd.f32 %v2245_v14, %v1437_v12  ;;  %v1217_v16 = vadd.f32 %v2933_v5, %v1216_v13  ;;  %v1441_v17 = vpop.f32.mrb[82].mxu1  ;;  %v1218_v18 = vpop.f32.mrb[83].mxu0 }
 0x26b   : > { %v1443_v19 = vpop.f32.mrb[83].mxu1 }
 0x26c   : > { %1595 = vst [vmem:[%s2940_s10 + $0x40] sm:$0xff] %v1563_v15  ;;  %v1442_v20 = vadd.f32 %v1441_v17, %v1217_v16  ;;  %v2253_v15 = vld [vmem:[%s2653_s14 + $0x80] sm:$0xff] }
 0x26d   : > { %v1221_v21 = vpop.f32.mrb[84].mxu0 }
 0x26e   : > { %v1564_v23 = vadd.f32 %v2246_v22, %v1442_v20  ;;  %v1222_v24 = vadd.f32 %v2933_v5, %v1221_v21  ;;  %v1446_v25 = vpop.f32.mrb[84].mxu1  ;;  %v1223_v26 = vpop.f32.mrb[85].mxu0 }
 0x26f   : > { %v1448_v27 = vpop.f32.mrb[85].mxu1 }
 0x270   : > { %1596 = vst [vmem:[%s2940_s10 + $0x48] sm:$0xff] %v1564_v23  ;;  %v1447_v28 = vadd.f32 %v1446_v25, %v1222_v24  ;;  %v2254_v23 = vld [vmem:[%s2653_s14 + $0x88] sm:$0xff] }
 0x271   : > { %v1226_v29 = vpop.f32.mrb[86].mxu0 }
 0x272   : > { %v1565_v31 = vadd.f32 %v2247_v30, %v1447_v28  ;;  %v1227_v39 = vadd.f32 %v2933_v5, %v1226_v29  ;;  %v1451_v32 = vpop.f32.mrb[86].mxu1  ;;  %v1228_v33 = vpop.f32.mrb[87].mxu0 }
 0x273   : > { %v1453_v34 = vpop.f32.mrb[87].mxu1 }
 0x274   : > { %1597 = vst [vmem:[%s2940_s10 + $0x50] sm:$0xff] %v1565_v31  ;;  %v1452_v35 = vadd.f32 %v1451_v32, %v1227_v39  ;;  %v2255_v31 = vld [vmem:[%s2653_s14 + $0x90] sm:$0xff] }
 0x275   : > { %v1231_v36 = vpop.f32.mrb[88].mxu0 }
 0x276   : > { %v1566_v38 = vadd.f32 %v2248_v37, %v1452_v35  ;;  %v1232_v40 = vadd.f32 %v2933_v5, %v1231_v36  ;;  %v1456_v41 = vpop.f32.mrb[88].mxu1  ;;  %v1233_v42 = vpop.f32.mrb[89].mxu0 }
 0x277   : > { %v1458_v43 = vpop.f32.mrb[89].mxu1 }
 0x278   : > { %1598 = vst [vmem:[%s2940_s10 + $0x58] sm:$0xff] %v1566_v38  ;;  %v1457_v44 = vadd.f32 %v1456_v41, %v1232_v40  ;;  %v2256_v38 = vld [vmem:[%s2653_s14 + $0x98] sm:$0xff] }
 0x279   : > { %v1236_v0 = vpop.f32.mrb[90].mxu0 }
 0x27a   : > { %v1567_v50 = vadd.f32 %v2249_v49, %v1457_v44  ;;  %v1237_v51 = vadd.f32 %v2933_v5, %v1236_v0  ;;  %v1461_v52 = vpop.f32.mrb[90].mxu1  ;;  %v1238_v53 = vpop.f32.mrb[91].mxu0 }
 0x27b   : > { %v1463_v54 = vpop.f32.mrb[91].mxu1 }
 0x27c   : > { %1599 = vst [vmem:[%s2940_s10 + $0x60] sm:$0xff] %v1567_v50  ;;  %v1462_v55 = vadd.f32 %v1461_v52, %v1237_v51  ;;  %v2257_v50 = vld [vmem:[%s2653_s14 + $0xa0] sm:$0xff] }
 0x27d   : > { %v1241_v56 = vpop.f32.mrb[92].mxu0 }
 0x27e   : > { %v1568_v58 = vadd.f32 %v2250_v57, %v1462_v55  ;;  %v1242_v59 = vadd.f32 %v2933_v5, %v1241_v56  ;;  %v1466_v60 = vpop.f32.mrb[92].mxu1  ;;  %v1243_v45 = vpop.f32.mrb[93].mxu0 }
 0x27f   : > { %v1468_v61 = vpop.f32.mrb[93].mxu1 }
 0x280   : > { %1600 = vst [vmem:[%s2940_s10 + $0x68] sm:$0xff] %v1568_v58  ;;  %v1467_v46 = vadd.f32 %v1466_v60, %v1242_v59  ;;  %v2258_v58 = vld [vmem:[%s2653_s14 + $0xa8] sm:$0xff] }
 0x281   : > { %v1246_v62 = vpop.f32.mrb[94].mxu0 }
 0x282   : > { %v1569_v63 = vadd.f32 %v2251_v47, %v1467_v46  ;;  %v1247_v48 = vadd.f32 %v2933_v5, %v1246_v62  ;;  %v1471_v1 = vpop.f32.mrb[94].mxu1  ;;  %v1248_v2 = vpop.f32.mrb[95].mxu0 }
 0x283   : > { %v1473_v3 = vpop.f32.mrb[95].mxu1 }
 0x284   : > { %1601 = vst [vmem:[%s2940_s10 + $0x70] sm:$0xff] %v1569_v63  ;;  %v1472_v4 = vadd.f32 %v1471_v1, %v1247_v48  ;;  %v2259_v63 = vld [vmem:[%s2653_s14 + $0xb0] sm:$0xff] }
 0x285   : > { %v1251_v6 = vpop.f32.mrb[96].mxu0 }
 0x286   : > { %v1570_v8 = vadd.f32 %v2252_v7, %v1472_v4  ;;  %v1252_v9 = vadd.f32 %v2933_v5, %v1251_v6  ;;  %v1476_v10 = vpop.f32.mrb[96].mxu1  ;;  %v1253_v11 = vpop.f32.mrb[97].mxu0 }
 0x287   : > { %v1478_v12 = vpop.f32.mrb[97].mxu1 }
 0x288   : > { %1602 = vst [vmem:[%s2940_s10 + $0x78] sm:$0xff] %v1570_v8  ;;  %v1477_v13 = vadd.f32 %v1476_v10, %v1252_v9  ;;  %v2260_v8 = vld [vmem:[%s2653_s14 + $0xb8] sm:$0xff] }
 0x289   : > { %v1256_v14 = vpop.f32.mrb[98].mxu0 }
 0x28a   : > { %v1571_v16 = vadd.f32 %v2253_v15, %v1477_v13  ;;  %v1257_v17 = vadd.f32 %v2933_v5, %v1256_v14  ;;  %v1481_v18 = vpop.f32.mrb[98].mxu1  ;;  %v1258_v19 = vpop.f32.mrb[99].mxu0 }
 0x28b   : > { %v1483_v20 = vpop.f32.mrb[99].mxu1 }
 0x28c   : > { %1603 = vst [vmem:[%s2940_s10 + $0x80] sm:$0xff] %v1571_v16  ;;  %v1482_v21 = vadd.f32 %v1481_v18, %v1257_v17  ;;  %v2261_v16 = vld [vmem:[%s2653_s14 + $0xc0] sm:$0xff] }
 0x28d   : > { %v1261_v22 = vpop.f32.mrb[100].mxu0 }
 0x28e   : > { %v1572_v24 = vadd.f32 %v2254_v23, %v1482_v21  ;;  %v1262_v25 = vadd.f32 %v2933_v5, %v1261_v22  ;;  %v1486_v26 = vpop.f32.mrb[100].mxu1  ;;  %v1263_v27 = vpop.f32.mrb[101].mxu0 }
 0x28f   : > { %v1488_v28 = vpop.f32.mrb[101].mxu1 }
 0x290   : > { %1604 = vst [vmem:[%s2940_s10 + $0x88] sm:$0xff] %v1572_v24  ;;  %v1487_v29 = vadd.f32 %v1486_v26, %v1262_v25  ;;  %v2262_v24 = vld [vmem:[%s2653_s14 + $0xc8] sm:$0xff] }
 0x291   : > { %v1266_v30 = vpop.f32.mrb[102].mxu0 }
 0x292   : > { %v1573_v39 = vadd.f32 %v2255_v31, %v1487_v29  ;;  %v1267_v32 = vadd.f32 %v2933_v5, %v1266_v30  ;;  %v1491_v33 = vpop.f32.mrb[102].mxu1  ;;  %v1268_v34 = vpop.f32.mrb[103].mxu0 }
 0x293   : > { %v1493_v35 = vpop.f32.mrb[103].mxu1 }
 0x294   : > { %1605 = vst [vmem:[%s2940_s10 + $0x90] sm:$0xff] %v1573_v39  ;;  %v1492_v36 = vadd.f32 %v1491_v33, %v1267_v32  ;;  %v2263_v39 = vld [vmem:[%s2653_s14 + $0xd0] sm:$0xff] }
 0x295   : > { %v1271_v37 = vpop.f32.mrb[104].mxu0 }
 0x296   : > { %v1574_v40 = vadd.f32 %v2256_v38, %v1492_v36  ;;  %v1272_v41 = vadd.f32 %v2933_v5, %v1271_v37  ;;  %v1496_v42 = vpop.f32.mrb[104].mxu1  ;;  %v1273_v43 = vpop.f32.mrb[105].mxu0 }
 0x297   : > { %v1498_v44 = vpop.f32.mrb[105].mxu1 }
 0x298   : > { %1606 = vst [vmem:[%s2940_s10 + $0x98] sm:$0xff] %v1574_v40  ;;  %v1497_v0 = vadd.f32 %v1496_v42, %v1272_v41  ;;  %v2264_v40 = vld [vmem:[%s2653_s14 + $0xd8] sm:$0xff] }
 0x299   : > { %v1276_v49 = vpop.f32.mrb[106].mxu0 }
 0x29a   : > { %v1575_v51 = vadd.f32 %v2257_v50, %v1497_v0  ;;  %v1277_v52 = vadd.f32 %v2933_v5, %v1276_v49  ;;  %v1501_v53 = vpop.f32.mrb[106].mxu1  ;;  %v1278_v54 = vpop.f32.mrb[107].mxu0 }
 0x29b   : > { %v1503_v55 = vpop.f32.mrb[107].mxu1 }
 0x29c   : > { %1607 = vst [vmem:[%s2940_s10 + $0xa0] sm:$0xff] %v1575_v51  ;;  %v1502_v56 = vadd.f32 %v1501_v53, %v1277_v52  ;;  %v2265_v51 = vld [vmem:[%s2653_s14 + $0xe0] sm:$0xff] }
 0x29d   : > { %v1281_v57 = vpop.f32.mrb[108].mxu0 }
 0x29e   : > { %v1576_v59 = vadd.f32 %v2258_v58, %v1502_v56  ;;  %v1282_v60 = vadd.f32 %v2933_v5, %v1281_v57  ;;  %v1506_v45 = vpop.f32.mrb[108].mxu1  ;;  %v1283_v61 = vpop.f32.mrb[109].mxu0 }
 0x29f   : > { %v1508_v46 = vpop.f32.mrb[109].mxu1 }
 0x2a0   : > { %1608 = vst [vmem:[%s2940_s10 + $0xa8] sm:$0xff] %v1576_v59  ;;  %v1507_v62 = vadd.f32 %v1506_v45, %v1282_v60  ;;  %v2266_v59 = vld [vmem:[%s2653_s14 + $0xe8] sm:$0xff] }
 0x2a1   : > { %v1286_v47 = vpop.f32.mrb[110].mxu0 }
 0x2a2   : > { %v1577_v48 = vadd.f32 %v2259_v63, %v1507_v62  ;;  %v1287_v1 = vadd.f32 %v2933_v5, %v1286_v47  ;;  %v1511_v2 = vpop.f32.mrb[110].mxu1  ;;  %v1288_v3 = vpop.f32.mrb[111].mxu0 }
 0x2a3   : > { %v1513_v4 = vpop.f32.mrb[111].mxu1 }
 0x2a4   : > { %1609 = vst [vmem:[%s2940_s10 + $0xb0] sm:$0xff] %v1577_v48  ;;  %v1512_v6 = vadd.f32 %v1511_v2, %v1287_v1  ;;  %v2267_v48 = vld [vmem:[%s2653_s14 + $0xf0] sm:$0xff] }
 0x2a5   : > { %v1291_v7 = vpop.f32.mrb[112].mxu0 }
 0x2a6   : > { %v1578_v9 = vadd.f32 %v2260_v8, %v1512_v6  ;;  %v1292_v10 = vadd.f32 %v2933_v5, %v1291_v7  ;;  %v1516_v11 = vpop.f32.mrb[112].mxu1  ;;  %v1293_v12 = vpop.f32.mrb[113].mxu0  ;;  %v2268_v8 = vld [vmem:[%s2653_s14 + $0xf8] sm:$0xff] }
 0x2a7   : > { %v1518_v13 = vpop.f32.mrb[113].mxu1 }
 0x2a8   : > { %1610 = vst [vmem:[%s2940_s10 + $0xb8] sm:$0xff] %v1578_v9  ;;  %v1517_v14 = vadd.f32 %v1516_v11, %v1292_v10 }
 0x2a9   : > { %v1296_v15 = vpop.f32.mrb[114].mxu0 }
 0x2aa   : > { %v1579_v17 = vadd.f32 %v2261_v16, %v1517_v14  ;;  %v1297_v18 = vadd.f32 %v2933_v5, %v1296_v15  ;;  %v1521_v19 = vpop.f32.mrb[114].mxu1  ;;  %v1298_v20 = vpop.f32.mrb[115].mxu0 }
 0x2ab   : > { %v1523_v21 = vpop.f32.mrb[115].mxu1 }
 0x2ac   : > { %1611 = vst [vmem:[%s2940_s10 + $0xc0] sm:$0xff] %v1579_v17  ;;  %v1522_v22 = vadd.f32 %v1521_v19, %v1297_v18 }
 0x2ad   : > { %v1301_v23 = vpop.f32.mrb[116].mxu0 }
 0x2ae   : > { %v1580_v25 = vadd.f32 %v2262_v24, %v1522_v22  ;;  %v1302_v26 = vadd.f32 %v2933_v5, %v1301_v23  ;;  %v1526_v27 = vpop.f32.mrb[116].mxu1  ;;  %v1303_v28 = vpop.f32.mrb[117].mxu0 }
 0x2af   : > { %v1528_v29 = vpop.f32.mrb[117].mxu1 }
 0x2b0   : > { %1612 = vst [vmem:[%s2940_s10 + $0xc8] sm:$0xff] %v1580_v25  ;;  %v1527_v30 = vadd.f32 %v1526_v27, %v1302_v26 }
 0x2b1   : > { %v1306_v31 = vpop.f32.mrb[118].mxu0 }
 0x2b2   : > { %v1581_v32 = vadd.f32 %v2263_v39, %v1527_v30  ;;  %v1307_v33 = vadd.f32 %v2933_v5, %v1306_v31  ;;  %v1531_v34 = vpop.f32.mrb[118].mxu1  ;;  %v1308_v35 = vpop.f32.mrb[119].mxu0 }
 0x2b3   : > { %v1533_v36 = vpop.f32.mrb[119].mxu1 }
 0x2b4   : > { %1613 = vst [vmem:[%s2940_s10 + $0xd0] sm:$0xff] %v1581_v32  ;;  %v1532_v37 = vadd.f32 %v1531_v34, %v1307_v33 }
 0x2b5   : > { %v1311_v38 = vpop.f32.mrb[120].mxu0 }
 0x2b6   : > { %v1582_v41 = vadd.f32 %v2264_v40, %v1532_v37  ;;  %v1312_v42 = vadd.f32 %v2933_v5, %v1311_v38  ;;  %v1536_v43 = vpop.f32.mrb[120].mxu1  ;;  %v1313_v44 = vpop.f32.mrb[121].mxu0 }
 0x2b7   : > { %v1538_v0 = vpop.f32.mrb[121].mxu1 }
 0x2b8   : > { %1614 = vst [vmem:[%s2940_s10 + $0xd8] sm:$0xff] %v1582_v41  ;;  %v1537_v49 = vadd.f32 %v1536_v43, %v1312_v42 }
 0x2b9   : > { %v1316_v50 = vpop.f32.mrb[122].mxu0 }
 0x2ba   : > { %v1583_v52 = vadd.f32 %v2265_v51, %v1537_v49  ;;  %v1317_v53 = vadd.f32 %v2933_v5, %v1316_v50  ;;  %v1541_v54 = vpop.f32.mrb[122].mxu1  ;;  %v1318_v55 = vpop.f32.mrb[123].mxu0 }
 0x2bb   : > { %v1543_v56 = vpop.f32.mrb[123].mxu1 }
 0x2bc   : > { %1615 = vst [vmem:[%s2940_s10 + $0xe0] sm:$0xff] %v1583_v52  ;;  %v1542_v57 = vadd.f32 %v1541_v54, %v1317_v53 }
 0x2bd   : > { %v1321_v58 = vpop.f32.mrb[124].mxu0 }
 0x2be   : > { %v1584_v60 = vadd.f32 %v2266_v59, %v1542_v57  ;;  %v1322_v45 = vadd.f32 %v2933_v5, %v1321_v58  ;;  %v1546_v61 = vpop.f32.mrb[124].mxu1  ;;  %v1323_v46 = vpop.f32.mrb[125].mxu0 }
 0x2bf   : > { %v1548_v62 = vpop.f32.mrb[125].mxu1 }
 0x2c0   : > { %1616 = vst [vmem:[%s2940_s10 + $0xe8] sm:$0xff] %v1584_v60  ;;  %v1547_v47 = vadd.f32 %v1546_v61, %v1322_v45 }
 0x2c1   : > { %v1326_v63 = vpop.f32.mrb[126].mxu0 }
 0x2c2   : > { %v1585_v1 = vadd.f32 %v2267_v48, %v1547_v47  ;;  %v1327_v2 = vadd.f32 %v2933_v5, %v1326_v63  ;;  %v1551_v3 = vpop.f32.mrb[126].mxu1  ;;  %v1328_v4 = vpop.f32.mrb[127].mxu0 }
 0x2c3   : > { %v1553_v6 = vpop.f32.mrb[127].mxu1 }
 0x2c4   : > { %1617 = vst [vmem:[%s2940_s10 + $0xf0] sm:$0xff] %v1585_v1  ;;  %v1552_v7 = vadd.f32 %v1551_v3, %v1327_v2 }
 0x2c6   : > { %v1586_v5 = vadd.f32 %v2268_v8, %v1552_v7 }
 0x2c8   : > { %1618 = vst [vmem:[%s2940_s10 + $0xf8] sm:$0xff] %v1586_v5 }
 0x2c9   : > { %2368 = shalt.err (!%p2365_p2)
}
 0x2ca   : > { %s2369_s14 = scalar_lea.hbm %s3038_s11, 4096  ;;  %s2373_s12 = scalar_lea.hbm %s3091_s5, 8192 }
 0x2cb   : > { %p2370_p13 = scmp.ne.s32.totalorder %s3038_s11, %s2369_s14  ;;  %p2374_p4 = scmp.lt.u32.totalorder %s3038_s11, %s3091_s5 }
 0x2cc   : > { %p2375_p7 = scmp.lt.u32.totalorder %s2373_s12, %s2369_s14  ;;  %p2377_p11 = scmp.lt.u32.totalorder %s2369_s14, %s3038_s11 }
 0x2cd   : > { %p2371_p6 = pnand %p2370_p13, %p3105_p0 }
 0x2ce   : > { %p2376_p8 = por %p2375_p7, %p2374_p4 }
 0x2cf   : > { %p2372_p10 = pneg %p2371_p6 }
 0x2d0   : > { %p2378_p1 = por %p2377_p11, %p2376_p8 }
 0x2d2   : > { %p2379_p3 = pnand %p2378_p1, %p2372_p10 }
 0x2d4   : > { %2382 = shalt.err (!%p2379_p3)
}
 0x2d5   : > { %s2437_s28 = smov 128   ;;  %s2438_s9 = smov 8  }
 0x2d6   : > { %1916 = dma.vmem_to_hbm [thread:$0]  (%p3105_p0), %s3040_s15, 4096, %s3038_s11, %s1620_s23, %s2437_s28, %s2437_s28, %s2438_s9  }
 0x2d7 PF: > { %s1648_s30 = sand.u32 1, %s2413_s18   ;;  %p3106_p5 = scmp.ne.s32.totalorder %s3096_s25, 0 }
 0x2d8   : > { %p3107_p9 = scmp.ge.s32.totalorder %s2425_s21, 2  ;;  %s1649_s7 = scalar_lea.sflag [#allocation4], %s1648_s30 }
 0x2da   : > { %p1930_p12 = pnand %p3107_p9, %p3106_p5 }
 0x2dc   : > { %2408 = dma.done.wait (!%p1930_p12), %s1649_s7, 4096  }
 0x2dd   : > { %2410 = vsyncadd (!%p1930_p12), %s1649_s7, 4294963200  ;;  %p19_p2 = scmp.ge.s32.totalorder %s2582_s16, 4   ;;  %s3108_s18 = smov %s2417_s19 }
 0x2de   : > { %s3109_s19 = smov %s2421_s20  ;;  %s3110_s20 = smov %s2591_s27 }
 0x2df   : > { %s3111_s21 = smov %s2582_s16  ;;  %21 = sbr.rel (!%p19_p2) target bundleno = 6 (0x6), region = 93 }
 0x2e6   :  { %1654 = vsyncpa [#allocation3], 1 }
 0x2e7   :  { %1656 = vsyncpa [#allocation3 + $0x1], 1 }
 0x2e8   :  { %1657 = vsyncpa [#allocation6], 1 }
 0x2e9   :  { %1658 = vsyncpa [#allocation4], 1 }
 0x2ea   :  { %1660 = vsyncpa [#allocation4 + $0x1], 1 }

</bundles_post_ra>
